<compile_context>
chip_gen: v6e
topology: v6e:2x2x1
jax: 0.10.0
libtpu: 0.0.40
codegen_flags: <defaults>
</compile_context>

<pallas_src>
import functools

import jax
import jax.numpy as jnp
from jax.experimental import pallas as pl
from jax.experimental.pallas import tpu as pltpu


# ---------------------------------------------------------------------------
# Kernels
# ---------------------------------------------------------------------------
def _sae_resident_kernel(x_ref, we_ref, be_ref, wd_ref, f_ref, r_ref):
    """Resident-weights path: grid = (batch tiles,), weights DMA'd once.

    x_ref  : (TB, D)  input rows
    we_ref : (D, H)   full encoder weight (pre-transposed), VMEM resident
    be_ref : (1, H)   full encoder bias
    wd_ref : (H, D)   full decoder weight (pre-transposed), VMEM resident
    f_ref  : (TB, H)  features output tile
    r_ref  : (TB, D)  reconstruction output tile
    """
    cdt = we_ref.dtype                              # compute dtype follows weights
    x = x_ref[...].astype(cdt)                      # explicit cast -> bf16 MXU peak
    pre = jnp.dot(x, we_ref[...], preferred_element_type=jnp.float32)
    pre = pre + be_ref[...].astype(jnp.float32)     # (1, H) broadcast over rows
    feats = jnp.maximum(pre, 0.0)                   # ReLU in f32
    f_ref[...] = feats.astype(f_ref.dtype)
    # Decoder fed directly from the SSA value (no f_ref store->reload round trip).
    r_ref[...] = jnp.dot(feats.astype(cdt), wd_ref[...],
                         preferred_element_type=jnp.float32).astype(r_ref.dtype)


def _sae_streamed_kernel_acc_in_out(x_ref, we_ref, be_ref, wd_ref, f_ref, r_ref):
    """Streamed-H path, f32 reconstruction: accumulate into the resident r block.

    x_ref  : (TB, D)       input rows (constant over j -> stays resident)
    we_ref : (D, TH)       encoder weight slice (streamed over j)
    be_ref : (H/TH, TH)    full bias, loaded once (constant index_map)
    wd_ref : (TH, D)       decoder weight slice (streamed over j)
    f_ref  : (TB, TH)      features output tile
    r_ref  : (TB, D)       f32 reconstruction tile, resident over j (accumulator)
    """
    j = pl.program_id(1)

    @pl.when(j == 0)
    def _():
        r_ref[...] = jnp.zeros_like(r_ref)

    cdt = we_ref.dtype
    x = x_ref[...].astype(cdt)
    pre = jnp.dot(x, we_ref[...], preferred_element_type=jnp.float32)
    pre = pre + be_ref[pl.ds(j, 1), :].astype(jnp.float32)   # bias row j -> (1, TH)
    feats = jnp.maximum(pre, 0.0)
    f_ref[...] = feats.astype(f_ref.dtype)
    r_ref[...] += jnp.dot(feats.astype(cdt), wd_ref[...],
                          preferred_element_type=jnp.float32)


def _sae_streamed_kernel_acc_scratch(x_ref, we_ref, be_ref, wd_ref, f_ref, r_ref,
                                     acc_ref):
    """Streamed-H path, non-f32 reconstruction: f32 VMEM scratch accumulator."""
    j = pl.program_id(1)

    @pl.when(j == 0)
    def _():
        acc_ref[...] = jnp.zeros_like(acc_ref)

    cdt = we_ref.dtype
    x = x_ref[...].astype(cdt)
    pre = jnp.dot(x, we_ref[...], preferred_element_type=jnp.float32)
    pre = pre + be_ref[pl.ds(j, 1), :].astype(jnp.float32)
    feats = jnp.maximum(pre, 0.0)
    f_ref[...] = feats.astype(f_ref.dtype)
    acc_ref[...] += jnp.dot(feats.astype(cdt), wd_ref[...],
                            preferred_element_type=jnp.float32)

    @pl.when(j == pl.num_programs(1) - 1)
    def _():
        r_ref[...] = acc_ref[...].astype(r_ref.dtype)


# ---------------------------------------------------------------------------
# Wrapper
# ---------------------------------------------------------------------------
def _vmem_budget_bytes():
    """Generation-aware scoped-VMEM budget in bytes."""
    cap = None
    try:
        cap = int(pltpu.get_tpu_info().vmem_capacity_bytes)
    except Exception:
        cap = None
    if cap is None:
        return 48 * 2**20                       # conservative: safe on all gens
    if cap <= 64 * 2**20:                       # v7x: 64 MiB physical per TC
        return int(cap * 0.82)                  # ~52 MiB, headroom for Mosaic scratch
    return min(int(cap * 0.80), 100 * 2**20)    # v5e/v6e: 128 MiB physical


def sparse_autoencoder_forward(x, w_enc_t, b_enc, w_dec_t, *,
                               tile_b=256, tile_h=512,
                               feature_dtype=None,
                               max_resident_weight_bytes=None):
    """Sparse autoencoder forward pass.

    Args:
      x        : [B, D]  input activations.
      w_enc_t  : [D, H]  encoder weight, pre-transposed from PyTorch layout [H, D].
      b_enc    : [H]     encoder bias.
      w_dec_t  : [H, D]  decoder weight, pre-transposed from PyTorch layout [D, H].
                 (Pass bf16 weights for v6e/v7x MXU peak; the kernel casts x to
                  the weight dtype and accumulates in f32.)
      tile_b   : batch tile; multiple of 8 (use >= 256 on HBM-starved v5e).
      tile_h   : hidden tile for the streamed path; multiple of 128.
      feature_dtype : dtype of the features output (default x.dtype; bf16 halves
                 the features HBM writeback).
      max_resident_weight_bytes : optional cap on total weight bytes allowed for
                 the resident-weights path (0 forces the streamed-H path).

    Returns:
      (features [B, H], reconstruction [B, D]).
    """
    B, D = x.shape
    H = w_enc_t.shape[1]
    assert w_enc_t.shape == (D, H)
    assert w_dec_t.shape == (H, D)
    assert b_enc.shape == (H,)

    f_dtype = jnp.dtype(feature_dtype) if feature_dtype is not None else jnp.dtype(x.dtype)
    r_dtype = jnp.dtype(x.dtype)

    tile_b = min(tile_b, B)
    assert B % tile_b == 0, "batch must be divisible by tile_b"
    assert tile_b == B or tile_b % 8 == 0

    isz = lambda dt: jnp.dtype(dt).itemsize
    xb, web, wdb = isz(x.dtype), isz(w_enc_t.dtype), isz(w_dec_t.dtype)
    fb, rb, bb = isz(f_dtype), isz(r_dtype), isz(b_enc.dtype)

    budget = _vmem_budget_bytes()
    flops = 4 * B * D * H
    n_btiles = B // tile_b

    # ---------------- Resident-weights path ----------------
    weight_bytes = D * H * web + H * D * wdb
    resident_vmem = (
        2 * weight_bytes                 # worst case: double-buffered weight blocks
        + 2 * tile_b * D * xb            # x tile
        + 2 * tile_b * H * fb            # features out tile
        + 2 * tile_b * D * rb            # reconstruction out tile
        + tile_b * H * 4                 # f32 feats intermediate (spill slack)
        + 2 * 8 * H * bb)                # bias (sublane-padded)
    resident_ok = resident_vmem <= budget
    if max_resident_weight_bytes is not None:
        resident_ok = resident_ok and (weight_bytes <= max_resident_weight_bytes)

    if resident_ok:
        bias2d = b_enc.reshape(1, H)
        bytes_accessed = (B * D * xb + weight_bytes + H * bb
                          + B * H * fb + B * D * rb)
        f, r = pl.pallas_call(
            _sae_resident_kernel,
            out_shape=(jax.ShapeDtypeStruct((B, H), f_dtype),
                       jax.ShapeDtypeStruct((B, D), r_dtype)),
            grid_spec=pltpu.PrefetchScalarGridSpec(
                num_scalar_prefetch=0,
                grid=(n_btiles,),
                in_specs=[
                    pl.BlockSpec((tile_b, D), lambda i: (i, 0)),   # x tile
                    pl.BlockSpec((D, H), lambda i: (0, 0)),        # W_enc^T (resident)
                    pl.BlockSpec((1, H), lambda i: (0, 0)),        # bias (resident)
                    pl.BlockSpec((H, D), lambda i: (0, 0)),        # W_dec^T (resident)
                ],
                out_specs=[
                    pl.BlockSpec((tile_b, H), lambda i: (i, 0)),   # features
                    pl.BlockSpec((tile_b, D), lambda i: (i, 0)),   # reconstruction
                ],
            ),
            compiler_params=pltpu.CompilerParams(
                dimension_semantics=("parallel",),     # splits across v7x's 2 TCs
                vmem_limit_bytes=budget,
            ),
            cost_estimate=pl.CostEstimate(flops=flops, transcendentals=0,
                                          bytes_accessed=bytes_accessed),
        )(x, w_enc_t, bias2d, w_dec_t)
        return f, r

    # ---------------- Streamed-H path (large SAEs) ----------------
    tile_h = min(tile_h, H)
    assert H % tile_h == 0, "hidden_dim must be divisible by tile_h"
    assert tile_h == H or tile_h % 128 == 0

    acc_in_out = (r_dtype == jnp.float32)   # accumulate directly into the r block

    def streamed_vmem(tb, th):
        return (2 * tb * D * xb                               # x tile
                + 2 * D * th * web                            # encoder weight tile
                + 2 * th * D * wdb                            # decoder weight tile
                + 2 * tb * th * fb                            # features tile
                + 2 * tb * D * (4 if acc_in_out else rb)      # recon tile
                + (0 if acc_in_out else tb * D * 4)           # f32 scratch acc
                + tb * th * 4                                 # f32 feats intermediate
                + 2 * 8 * H * bb)                             # full bias (resident)

    # Shrink tiles if the requested configuration does not fit the VMEM budget.
    while streamed_vmem(tile_b, tile_h) > budget and tile_h > 128 and tile_h % 256 == 0:
        tile_h //= 2
    while streamed_vmem(tile_b, tile_h) > budget and tile_b > 8 and tile_b % 16 == 0:
        tile_b //= 2
    n_btiles = B // tile_b
    n_htiles = H // tile_h

    bias2d = b_enc.reshape(n_htiles, tile_h)
    bytes_accessed = (B * D * xb
                      + n_btiles * (D * H * web + H * D * wdb)   # weight re-streams
                      + H * bb
                      + B * H * fb + B * D * rb)

    kernel = (_sae_streamed_kernel_acc_in_out if acc_in_out
              else _sae_streamed_kernel_acc_scratch)
    scratch = [] if acc_in_out else [pltpu.VMEM((tile_b, D), jnp.float32)]

    f, r = pl.pallas_call(
        kernel,
        out_shape=(jax.ShapeDtypeStruct((B, H), f_dtype),
                   jax.ShapeDtypeStruct((B, D), r_dtype)),
        grid_spec=pltpu.PrefetchScalarGridSpec(
            num_scalar_prefetch=0,
            grid=(n_btiles, n_htiles),            # reduction (hidden) axis last
            in_specs=[
                pl.BlockSpec((tile_b, D), lambda i, j: (i, 0)),        # x tile
                pl.BlockSpec((D, tile_h), lambda i, j: (0, j)),        # W_enc^T slice
                pl.BlockSpec((n_htiles, tile_h), lambda i, j: (0, 0)), # full bias
                pl.BlockSpec((tile_h, D), lambda i, j: (j, 0)),        # W_dec^T slice
            ],
            out_specs=[
                pl.BlockSpec((tile_b, tile_h), lambda i, j: (i, j)),   # features
                pl.BlockSpec((tile_b, D), lambda i, j: (i, 0)),        # reconstruction
            ],
            scratch_shapes=scratch,
        ),
        compiler_params=pltpu.CompilerParams(
            dimension_semantics=("parallel", "arbitrary"),
            vmem_limit_bytes=budget,
        ),
        cost_estimate=pl.CostEstimate(flops=flops, transcendentals=0,
                                      bytes_accessed=bytes_accessed),
    )(x, w_enc_t, bias2d, w_dec_t)
    return f, r


# ---------------------------------------------------------------------------
# Test
# ---------------------------------------------------------------------------
if __name__ == "__main__":
    # Small, TPU-friendly shapes: 2 batch tiles at tile_b=256, multiple H tiles
    # when the streamed path is forced.
    B, D, H = 512, 256, 512   # batch, input_dim, hidden_dim

    key = jax.random.PRNGKey(0)
    kx, kwe, kbe, kwd = jax.random.split(key, 4)

    x = jax.random.normal(kx, (B, D), dtype=jnp.float32)
    # Deterministic synthetic params (mimic nn.Linear uniform init scale).
    w_enc = jax.random.uniform(kwe, (H, D), jnp.float32, -1.0, 1.0) / jnp.sqrt(D)
    b_enc = jax.random.uniform(kbe, (H,), jnp.float32, -1.0, 1.0) / jnp.sqrt(D)
    w_dec = jax.random.uniform(kwd, (D, H), jnp.float32, -1.0, 1.0) / jnp.sqrt(H)

    # Transpose once, outside the hot path (PyTorch Linear stores [out, in]).
    w_enc_t = jnp.asarray(w_enc.T)   # [D, H]
    w_dec_t = jnp.asarray(w_dec.T)   # [H, D]

    # Full-precision reference.
    hp = jax.lax.Precision.HIGHEST
    feats_ref = jnp.maximum(jnp.dot(x, w_enc.T, precision=hp) + b_enc, 0.0)
    recon_ref = jnp.dot(feats_ref, w_dec.T, precision=hp)

    # 1) f32 weights, resident-weights path (auto-selected at these sizes).
    fwd_res = jax.jit(functools.partial(sparse_autoencoder_forward,
                                        tile_b=256, tile_h=512))
    f1, r1 = fwd_res(x, w_enc_t, b_enc, w_dec_t)
    jax.block_until_ready((f1, r1))
    assert f1.shape == (B, H) and r1.shape == (B, D)
    assert jnp.allclose(f1, feats_ref, atol=1e-5, rtol=1e-5)
    assert jnp.allclose(r1, recon_ref, atol=1e-4, rtol=1e-4)

    # 2) f32 weights, forced streamed-H path (large-H code path).
    fwd_str = jax.jit(functools.partial(sparse_autoencoder_forward,
                                        tile_b=256, tile_h=128,
                                        max_resident_weight_bytes=0))
    f2, r2 = fwd_str(x, w_enc_t, b_enc, w_dec_t)
    jax.block_until_ready((f2, r2))
    assert jnp.allclose(f2, feats_ref, atol=1e-5, rtol=1e-5)
    assert jnp.allclose(r2, recon_ref, atol=1e-4, rtol=1e-4)

    # 3) bf16 weights + bf16 features output (fast MXU path, f32 accumulation).
    fwd_bf16 = jax.jit(functools.partial(sparse_autoencoder_forward,
                                         tile_b=256, tile_h=512,
                                         feature_dtype=jnp.bfloat16))
    f3, r3 = fwd_bf16(x, w_enc_t.astype(jnp.bfloat16), b_enc,
                      w_dec_t.astype(jnp.bfloat16))
    jax.block_until_ready((f3, r3))
    assert jnp.allclose(f3.astype(jnp.float32), feats_ref, atol=5e-2, rtol=5e-2)
    assert jnp.allclose(r3.astype(jnp.float32), recon_ref, atol=5e-2, rtol=5e-2)

    print("KERNEL_OK")
</pallas_src>

<mosaic_0001>
module attributes {stable_mosaic.version = 11 : i64} {
  func.func @_sae_resident_kernel(%arg0: i32, %arg1: memref<256x256xf32, #tpu.memory_space<vmem>>, %arg2: memref<256x512xf32, #tpu.memory_space<vmem>>, %arg3: memref<1x512xf32, #tpu.memory_space<vmem>>, %arg4: memref<512x256xf32, #tpu.memory_space<vmem>>, %arg5: memref<256x512xf32, #tpu.memory_space<vmem>>, %arg6: memref<256x256xf32, #tpu.memory_space<vmem>>) attributes {dimension_semantics = [#tpu.dimension_semantics<parallel>], iteration_bounds = array<i64: 2>, scalar_prefetch = 0 : i64, scratch_operands = 0 : i64, tpu.core_type = #tpu.core_type<tc>, window_params = [{transform_indices = @transform_0, window_bounds = array<i64: 256, 256>}, {pipeline_mode = #tpu.pipeline_mode<synchronous>, transform_indices = @transform_1, window_bounds = array<i64: 256, 512>}, {pipeline_mode = #tpu.pipeline_mode<synchronous>, transform_indices = @transform_2, window_bounds = array<i64: 1, 512>}, {pipeline_mode = #tpu.pipeline_mode<synchronous>, transform_indices = @transform_3, window_bounds = array<i64: 512, 256>}, {transform_indices = @transform_4, window_bounds = array<i64: 256, 512>}, {transform_indices = @transform_5, window_bounds = array<i64: 256, 256>}]} {
    %c0 = arith.constant 0 : index
    %c0_0 = arith.constant 0 : index
    %0 = vector.load %arg1[%c0, %c0_0] : memref<256x256xf32, #tpu.memory_space<vmem>>, vector<256x256xf32>
    %c0_1 = arith.constant 0 : index
    %c0_2 = arith.constant 0 : index
    %1 = vector.load %arg2[%c0_1, %c0_2] : memref<256x512xf32, #tpu.memory_space<vmem>>, vector<256x512xf32>
    %cst = arith.constant dense<0.000000e+00> : vector<256x512xf32>
    %2 = tpu.matmul %0, %1, %cst {dimension_numbers = #tpu.dot_dimension_numbers<[1], [0], [0], [1], [0, 0, 1, 1], [], []>} : vector<256x256xf32>, vector<256x512xf32>, vector<256x512xf32> -> vector<256x512xf32>
    %c0_3 = arith.constant 0 : index
    %c0_4 = arith.constant 0 : index
    %3 = vector.load %arg3[%c0_3, %c0_4] : memref<1x512xf32, #tpu.memory_space<vmem>>, vector<1x512xf32>
    %4 = vector.broadcast %3 : vector<1x512xf32> to vector<256x512xf32>
    %5 = arith.addf %2, %4 : vector<256x512xf32>
    %cst_5 = arith.constant 0.000000e+00 : f32
    %6 = vector.broadcast %cst_5 : f32 to vector<256x512xf32>
    %7 = arith.maximumf %5, %6 : vector<256x512xf32>
    %c0_6 = arith.constant 0 : index
    %c0_7 = arith.constant 0 : index
    %8 = vector.load %arg5[%c0_6, %c0_7] : memref<256x512xf32, #tpu.memory_space<vmem>>, vector<256x512xf32>
    tpu.vector_store %arg5[%c0_6, %c0_7], %7 {strides = array<i32>} : memref<256x512xf32, #tpu.memory_space<vmem>>, vector<256x512xf32>,
    %c0_8 = arith.constant 0 : index
    %c0_9 = arith.constant 0 : index
    %9 = vector.load %arg4[%c0_8, %c0_9] : memref<512x256xf32, #tpu.memory_space<vmem>>, vector<512x256xf32>
    %cst_10 = arith.constant dense<0.000000e+00> : vector<256x256xf32>
    %10 = tpu.matmul %7, %9, %cst_10 {dimension_numbers = #tpu.dot_dimension_numbers<[1], [0], [0], [1], [0, 0, 1, 1], [], []>} : vector<256x512xf32>, vector<512x256xf32>, vector<256x256xf32> -> vector<256x256xf32>
    %c0_11 = arith.constant 0 : index
    %c0_12 = arith.constant 0 : index
    %11 = vector.load %arg6[%c0_11, %c0_12] : memref<256x256xf32, #tpu.memory_space<vmem>>, vector<256x256xf32>
    tpu.vector_store %arg6[%c0_11, %c0_12], %10 {strides = array<i32>} : memref<256x256xf32, #tpu.memory_space<vmem>>, vector<256x256xf32>,
    return
  }
  func.func @transform_0(%arg0: i32) -> (i32, i32) {
    %c0_i32 = arith.constant 0 : i32
    %c0_i32_0 = arith.constant 0 : i32
    return %arg0, %c0_i32 : i32, i32
  }
  func.func @transform_1(%arg0: i32) -> (i32, i32) {
    %c0_i32 = arith.constant 0 : i32
    %c0_i32_0 = arith.constant 0 : i32
    %c0_i32_1 = arith.constant 0 : i32
    return %c0_i32, %c0_i32_0 : i32, i32
  }
  func.func @transform_2(%arg0: i32) -> (i32, i32) {
    %c0_i32 = arith.constant 0 : i32
    %c0_i32_0 = arith.constant 0 : i32
    %c0_i32_1 = arith.constant 0 : i32
    return %c0_i32, %c0_i32_0 : i32, i32
  }
  func.func @transform_3(%arg0: i32) -> (i32, i32) {
    %c0_i32 = arith.constant 0 : i32
    %c0_i32_0 = arith.constant 0 : i32
    %c0_i32_1 = arith.constant 0 : i32
    return %c0_i32, %c0_i32_0 : i32, i32
  }
  func.func @transform_4(%arg0: i32) -> (i32, i32) {
    %c0_i32 = arith.constant 0 : i32
    %c0_i32_0 = arith.constant 0 : i32
    return %arg0, %c0_i32 : i32, i32
  }
  func.func @transform_5(%arg0: i32) -> (i32, i32) {
    %c0_i32 = arith.constant 0 : i32
    %c0_i32_0 = arith.constant 0 : i32
    return %arg0, %c0_i32 : i32, i32
  }
}

</mosaic_0001>

<bundles_post_ra>
// kernel: sparse_autoencoder_forward.1
= control target key start
LH: loop header
LB: loop body
LE: loop exit
PB: predicated region body
PF: predicated region fallthrough
CT: control target
= control target key end

     0   :  { %11 = vsyncpa [#allocation3], 0  ;;  %s3105_s0 = inlined_call_operand.hbm [shape: f32[512,256], index: 0, kind: input, shape index: {}]   ;;  %s3106_s1 = inlined_call_operand.hbm [shape: f32[256,512], index: 1, kind: input, shape index: {}]   ;;  %s3107_s2 = inlined_call_operand.vmem [shape: f32[1,512], index: 2, kind: input, shape index: {}]   ;;  %s3108_s3 = inlined_call_operand.hbm [shape: f32[512,256], index: 3, kind: input, shape index: {}]   ;;  %s3109_s4 = inlined_call_operand.hbm [shape: f32[512,512], index: 4, kind: output, shape index: {0}]   ;;  %s3110_s5 = inlined_call_operand.hbm [shape: f32[512,256], index: 5, kind: output, shape index: {1}]  }
   0x1   :  { %13 = vsyncpa [#allocation3 + $0x1], 0 }
   0x2   :  { %14 = vsyncpa [#allocation6], 0 }
   0x3   :  { %15 = vsyncpa [#allocation4], 0 }
   0x4   :  { %17 = vsyncpa [#allocation4 + $0x1], 0 }
   0x5   :  { %18 = vsyncpa [#allocation10], 0 }
   0x6   :  { %20 = vsyncpa [#allocation10 + $0x1], 0  ;;  %s2472_s18 = smov 0   ;;  %s2474_s19 = smov 0  }
   0x7   :  { %s2476_s20 = smov 0   ;;  %s2478_s21 = smov 0  }
   0x8 LB: > { %s2493_s22 = sadd.s32 4294967295, %s2427_s21   ;;  %s2138_s23 = sadd.s32 4294967294, %s2427_s21   ;;  %s2427_s21 = sphi %s2478_s21, %s3134_s21   ;;  %s2423_s20 = sphi %s2476_s20, %s3133_s20   ;;  %s2419_s19 = sphi %s2474_s19, %s3132_s19   ;;  %s2415_s18 = sphi %s2472_s18, %s3131_s18  }
   0x9   : > { %p46_p0 = scmp.ne.s32.totalorder %s2419_s19, %s2415_s18  ;;  %p3111_p1 = scmp.eq.s32.totalorder %s2493_s22, 0 }
   0xa   : > { %p139_p3 = scmp.eq.s32.totalorder %s2138_s23, 1  ;;  %p2139_p5 = scmp.ge.s32.totalorder %s2427_s21, 1 }
   0xb   : > { %p2502_p4 = por %p3111_p1, %p46_p0  ;;  %p172_p7 = scmp.lt.s32.totalorder %s2427_s21, 3 }
   0xc   : > { %p2507_p6 = por %p139_p3, %p46_p0  ;;  %s2429_s27 = smov [#allocation5]  }
   0xd   : > { %s3116_s24 = scalar_select %p2502_p4, 1, 0 }
   0xe   : > { %s3117_s25 = scalar_select %p2507_p6, 1, 0 }
   0xf   : > { %p2512_p8 = pnand %p2139_p5, %p172_p7  ;;  %s184_s28 = sshll.u32 %s2429_s27, 4  ;;  %s185_s28 = int_to_ptr.vmem [resolvable:$true] %s184_s28 }
  0x10   : > { %s2430_s30 = smov [#allocation7]   ;;  %s2260_s7 = scalar_lea.vmem %s185_s28, 16384 }
  0x11   : > { %s3118_s26 = scalar_select %p2512_p8, 1, 0 }
  0x12   : > { %p2183_p9 = pneg %p2512_p8  ;;  %s200_s6 = sshll.u32 %s2430_s30, 4  ;;  %s201_s6 = int_to_ptr.vmem [resolvable:$true] %s200_s6 }
  0x13   : > { %p2261_p13 = scmp.ne.s32.totalorder %s185_s28, %s2260_s7  ;;  %p2268_p5 = scmp.lt.s32.totalorder %s185_s28, %s185_s28 }
  0x14   : > { %p2521_p11 = pnand %p2183_p9, %p3111_p1  ;;  %p2269_p7 = scmp.lt.s32.totalorder %s2260_s7, %s2260_s7 }
  0x16   : > { %p2251_p12 = pneg %p2521_p11  ;;  %p2270_p10 = por %p2269_p7, %p2268_p5 }
  0x18   : > { %p2263_p0 = pnand %p2261_p13, %p2251_p12 }
  0x1a   : > { %p2264_p3 = pneg %p2263_p0 }
  0x1c   : > { %p2271_p9 = pnand %p2270_p10, %p2264_p3 }
  0x1e   : > { %2274 = shalt.err (!%p2271_p9)
}
  0x1f   : > { %s2431_s8 = smov 512   ;;  %s2432_s9 = smov 32  }
  0x20   : > { %2186 = dma.hbm_to_vmem [thread:$0]  (!%p2521_p11), %s3106_s1, 16384, %s185_s28, [#allocation6], %s2431_s8, %s2431_s8, %s2432_s9  }
  0x21   : > { %s2286_s12 = scalar_lea.vmem %s201_s6, 16384  ;;  %p2294_p2 = scmp.lt.s32.totalorder %s201_s6, %s201_s6 }
  0x22   : > { %p2287_p1 = scmp.ne.s32.totalorder %s201_s6, %s2286_s12  ;;  %p2295_p6 = scmp.lt.s32.totalorder %s2286_s12, %s2286_s12 }
  0x24   : > { %p2289_p13 = pnand %p2287_p1, %p2251_p12  ;;  %p2296_p5 = por %p2295_p6, %p2294_p2 }
  0x26   : > { %p2290_p0 = pneg %p2289_p13 }
  0x28   : > { %p2297_p10 = pnand %p2296_p5, %p2290_p0 }
  0x2a   : > { %2300 = shalt.err (!%p2297_p10)
}
  0x2b   : > { %s3112_s13 = smov 256   ;;  %s2434_s14 = smov 16  }
  0x2c   : > { %2189 = dma.hbm_to_vmem [thread:$0]  (!%p2521_p11), %s3108_s3, 16384, %s201_s6, [#allocation6], %s3112_s13, %s3112_s13, %s2434_s14  }
  0x2d   : > { %s2547_s17 = sadd.s32 1, %s2427_s21   ;;  %s33_s27 = sadd.s32 1, %s2423_s20 }
  0x2e   : > { %s30_s23 = ssub.s32 %s2427_s21, %s2547_s17  ;;  %p40_p2 = scmp.ne.s32.totalorder %s2423_s20, %s2419_s19 }
  0x2f   : > { %p31_p1 = scmp.eq.s32.totalorder %s30_s23, 0  ;;  %p41_p6 = scmp.eq.s32.totalorder %s2427_s21, 0 }
  0x30   : > { %p3120_p3 = scmp.eq.s32.totalorder %s2493_s22, 1  ;;  %p2203_p9 = scmp.lt.s32.totalorder %s2427_s21, 2 }
  0x31   : > { %s2556_s28 = scalar_select %p31_p1, %s2423_s20, %s33_s27  }
  0x32   : > { %p42_p12 = por %p41_p6, %p40_p2  ;;  %p2560_p7 = por %p3120_p3, %p40_p2 }
  0x33   : > { %s214_s30 = sand.u32 1, %s2423_s20   ;;  %s2164_s6 = sshll.u32 %s2427_s21, 13 }
  0x34   : > { %s3121_s29 = scalar_select %p2560_p7, 1, 0 }
  0x35   : > { %s2143_s7 = sshll.u32 %s214_s30, 9  ;;  %s2570_s10 = scalar_lea.hbm %s3105_s0, %s2164_s6 }
  0x36   : > { %s218_s11 = scalar_lea.vmem [#allocation2], %s2143_s7  ;;  %p2574_p11 = pnand %p2203_p9, %p42_p12 }
  0x37   : > { %s226_s12 = sshll.u32 %s218_s11, 4  ;;  %s2578_s16 = scalar_lea.sflag [#allocation3], %s214_s30  ;;  %s2572_s12 = int_to_ptr.vmem [resolvable:$true] %s226_s12 }
  0x38   : > { %s2301_s23 = scalar_lea.hbm %s2570_s10, 8192  ;;  %p2303_p0 = pneg %p2574_p11 }
  0x39   : > { %p2302_p13 = scmp.ne.s32.totalorder %s2570_s10, %s2301_s23  ;;  %s2306_s7 = scalar_lea.hbm %s3105_s0, 16384 }
  0x3a   : > { %p2307_p1 = scmp.lt.s32.totalorder %s2570_s10, %s3105_s0  ;;  %p2308_p2 = scmp.lt.s32.totalorder %s2306_s7, %s2301_s23 }
  0x3b   : > { %p2304_p5 = pnand %p2303_p0, %p2302_p13 }
  0x3c   : > { %p2309_p6 = por %p2308_p2, %p2307_p1 }
  0x3d   : > { %p2305_p10 = pneg %p2304_p5 }
  0x3f   : > { %p2310_p12 = pnand %p2309_p6, %p2305_p10 }
  0x41   : > { %2313 = shalt.err (!%p2310_p12)
}
  0x42   : > { %s2314_s30 = scalar_lea.vmem %s2572_s12, 8192  ;;  %s2435_s11 = smov [#allocation2]  }
  0x43   : > { %p2315_p3 = scmp.ne.s32.totalorder %s2572_s12, %s2314_s30  ;;  %s2319_s13 = sshll.u32 %s2435_s11, 4  ;;  %s2320_s13 = int_to_ptr.vmem [resolvable:$false] %s2319_s13 }
  0x44   : > { %s2321_s27 = scalar_lea.vmem %s2320_s13, 16384  ;;  %p2322_p5 = scmp.lt.s32.totalorder %s2572_s12, %s2320_s13 }
  0x45   : > { %p2317_p9 = pnand %p2315_p3, %p2303_p0  ;;  %p2323_p7 = scmp.lt.s32.totalorder %s2321_s27, %s2314_s30 }
  0x47   : > { %p2318_p13 = pneg %p2317_p9  ;;  %p2324_p4 = por %p2323_p7, %p2322_p5 }
  0x49   : > { %p2325_p8 = pnand %p2324_p4, %p2318_p13 }
  0x4b   : > { %2328 = shalt.err (!%p2325_p8)
}
  0x4c   : > { %s3123_s23 = smov 256   ;;  %p3124_p0 = scmp.ne.s32.totalorder %s3118_s26, 0 }
  0x4d   : > { %2193 = dma.hbm_to_vmem [thread:$0]  (!%p2574_p11), %s2570_s10, 8192, %s2572_s12, %s2578_s16, %s3123_s23, %s3123_s23, %s2434_s14  }
  0x4e   : > { %238 = sbr.rel (%p3124_p0) target bundleno = 699 (0x2bb), region = 36  ;;  %s2605_s6 = sand.u32 (!%p3124_p0), 1, %s2419_s19  }
  0x4f   : > { %s2148_s13 = sshll.u32 (!%p3124_p0), %s2605_s6, 9  ;;  %s241_s7 = scalar_lea.sflag (!%p3124_p0), [#allocation3], %s2605_s6 }
  0x50   : > { %s2611_s15 = scalar_lea.vmem (!%p3124_p0), [#allocation2], %s2148_s13  ;;  %p3125_p4 = scmp.ne.s32.totalorder (!%p3124_p0), %s3116_s24, 0 }
  0x53   : > { %2398 = dma.done.wait (%p3125_p4), %s241_s7, 8192  }
  0x54   : > { %2400 = vsyncadd (%p3125_p4), %s241_s7, 4294959104  ;;  %p3126_p8 = scmp.eq.s32.totalorder %s2493_s22, 0 }
  0x56   : > { %2402 = dma.done.wait (%p3126_p8), [#allocation6], 32768   ;;  %p3127_p7 = pmov %p3126_p8 }
  0x57   : > { %v412_v0 = vld [vmem:[#allocation5 + $0x1e8] sm:$0xff]  ;;  %v414_v1 = vld [vmem:[#allocation5 + $0x1f8] sm:$0xff]  ;;  %v411_v2 = vld [vmem:[#allocation5 + $0x1e0] sm:$0xff]  ;;  %s2151_s14 = sshll.u32 %s2605_s6, 10  ;;  %s2166_s12 = sshll.u32 %s2493_s22, 14 }
  0x58   : > { %2404 = vsyncadd (%p3127_p7), [#allocation6], 4294934528  ;;  %501 = vmatprep.subr.mxu0 %v412_v0  ;;  %758 = vmatprep.subr.mxu1 %v414_v1  ;;  %v413_v3 = vld [vmem:[#allocation5 + $0x1f0] sm:$0xff]  ;;  %v408_v4 = vld [vmem:[#allocation5 + $0x1c8] sm:$0xff]  ;;  %s2701_s10 = scalar_lea.vmem [#allocation8], %s2151_s14  ;;  %s2960_s30 = scalar_lea.hbm %s3109_s4, %s2166_s12 }
  0x59   : > { %v410_v5 = vld [vmem:[#allocation5 + $0x1d8] sm:$0xff]  ;;  %502 = vmatpush1.msra.mxu0 %v411_v2  ;;  %759 = vmatpush1.msra.mxu1 %v413_v3  ;;  %v407_v6 = vld [vmem:[#allocation5 + $0x1c0] sm:$0xff]  ;;  %v409_v7 = vld [vmem:[#allocation5 + $0x1d0] sm:$0xff]  ;;  %s1997_s16 = sshll.u32 %s2701_s10, 4  ;;  %s2966_s11 = scalar_lea.vmem [#allocation9], %s2148_s13  ;;  %s2962_s16 = int_to_ptr.vmem [resolvable:$true] %s1997_s16 }
  0x5a   : > { %v404_v8 = vld [vmem:[#allocation5 + $0x1a8] sm:$0xff]  ;;  %503 = vmatprep.subr.mxu0 %v408_v4  ;;  %760 = vmatprep.subr.mxu1 %v410_v5  ;;  %v406_v9 = vld [vmem:[#allocation5 + $0x1b8] sm:$0xff]  ;;  %v403_v10 = vld [vmem:[#allocation5 + $0x1a0] sm:$0xff]  ;;  %s1978_s27 = scalar_lea.sflag [#allocation4], %s2605_s6  ;;  %s2329_s23 = scalar_lea.vmem %s2962_s16, 16384 }
  0x5b   : > { %v405_v11 = vld [vmem:[#allocation5 + $0x1b0] sm:$0xff]  ;;  %504 = vmatpush1.msra.mxu0 %v407_v6  ;;  %761 = vmatpush1.msra.mxu1 %v409_v7  ;;  %v400_v12 = vld [vmem:[#allocation5 + $0x188] sm:$0xff]  ;;  %v402_v13 = vld [vmem:[#allocation5 + $0x198] sm:$0xff]  ;;  %p2330_p11 = scmp.ne.s32.totalorder %s2962_s16, %s2329_s23  ;;  %p3128_p10 = scmp.ne.s32.totalorder %s3121_s29, 0 }
  0x5c   : > { %505 = vmatprep.subr.mxu0 %v404_v8  ;;  %762 = vmatprep.subr.mxu1 %v406_v9  ;;  %v399_v14 = vld [vmem:[#allocation5 + $0x180] sm:$0xff]  ;;  %v401_v15 = vld [vmem:[#allocation5 + $0x190] sm:$0xff]  ;;  %v396_v16 = vld [vmem:[#allocation5 + $0x168] sm:$0xff]  ;;  %s2436_s7 = smov [#allocation8]  }
  0x5d   : > { %506 = vmatpush1.msra.mxu0 %v403_v10  ;;  %763 = vmatpush1.msra.mxu1 %v405_v11  ;;  %v398_v17 = vld [vmem:[#allocation5 + $0x178] sm:$0xff]  ;;  %v395_v18 = vld [vmem:[#allocation5 + $0x160] sm:$0xff]  ;;  %v397_v19 = vld [vmem:[#allocation5 + $0x170] sm:$0xff]  ;;  %p2331_p1 = pnand %p2330_p11, %p3128_p10 }
  0x5e   : > { %507 = vmatprep.subr.mxu0 %v400_v12  ;;  %764 = vmatprep.subr.mxu1 %v402_v13  ;;  %v392_v20 = vld [vmem:[#allocation5 + $0x148] sm:$0xff]  ;;  %v394_v21 = vld [vmem:[#allocation5 + $0x158] sm:$0xff]  ;;  %v391_v22 = vld [vmem:[#allocation5 + $0x140] sm:$0xff] }
  0x5f   : > { %508 = vmatpush1.msra.mxu0 %v399_v14  ;;  %765 = vmatpush1.msra.mxu1 %v401_v15  ;;  %v393_v23 = vld [vmem:[#allocation5 + $0x150] sm:$0xff]  ;;  %v388_v24 = vld [vmem:[#allocation5 + $0x128] sm:$0xff]  ;;  %v390_v25 = vld [vmem:[#allocation5 + $0x138] sm:$0xff]  ;;  %p2332_p2 = pneg %p2331_p1 }
  0x60   : > { %509 = vmatprep.subr.mxu0 %v396_v16  ;;  %766 = vmatprep.subr.mxu1 %v398_v17  ;;  %v387_v26 = vld [vmem:[#allocation5 + $0x120] sm:$0xff]  ;;  %v389_v27 = vld [vmem:[#allocation5 + $0x130] sm:$0xff]  ;;  %v384_v28 = vld [vmem:[#allocation5 + $0x108] sm:$0xff] }
  0x61   : > { %510 = vmatpush1.msra.mxu0 %v395_v18  ;;  %767 = vmatpush1.msra.mxu1 %v397_v19  ;;  %v386_v29 = vld [vmem:[#allocation5 + $0x118] sm:$0xff]  ;;  %v383_v30 = vld [vmem:[#allocation5 + $0x100] sm:$0xff]  ;;  %v385_v31 = vld [vmem:[#allocation5 + $0x110] sm:$0xff] }
  0x62   : > { %511 = vmatprep.subr.mxu0 %v392_v20  ;;  %768 = vmatprep.subr.mxu1 %v394_v21  ;;  %v380_v32 = vld [vmem:[#allocation5 + $0xe8] sm:$0xff]  ;;  %v382_v33 = vld [vmem:[#allocation5 + $0xf8] sm:$0xff]  ;;  %v379_v34 = vld [vmem:[#allocation5 + $0xe0] sm:$0xff] }
  0x63   : > { %512 = vmatpush1.msra.mxu0 %v391_v22  ;;  %769 = vmatpush1.msra.mxu1 %v393_v23  ;;  %v381_v35 = vld [vmem:[#allocation5 + $0xf0] sm:$0xff]  ;;  %v376_v36 = vld [vmem:[#allocation5 + $0xc8] sm:$0xff]  ;;  %v378_v37 = vld [vmem:[#allocation5 + $0xd8] sm:$0xff] }
  0x64   : > { %513 = vmatprep.subr.mxu0 %v388_v24  ;;  %770 = vmatprep.subr.mxu1 %v390_v25  ;;  %v375_v38 = vld [vmem:[#allocation5 + $0xc0] sm:$0xff]  ;;  %v377_v39 = vld [vmem:[#allocation5 + $0xd0] sm:$0xff]  ;;  %v372_v40 = vld [vmem:[#allocation5 + $0xa8] sm:$0xff] }
  0x65   : > { %514 = vmatpush1.msra.mxu0 %v387_v26  ;;  %771 = vmatpush1.msra.mxu1 %v389_v27  ;;  %v374_v41 = vld [vmem:[#allocation5 + $0xb8] sm:$0xff]  ;;  %v371_v42 = vld [vmem:[#allocation5 + $0xa0] sm:$0xff]  ;;  %v373_v43 = vld [vmem:[#allocation5 + $0xb0] sm:$0xff] }
  0x66   : > { %515 = vmatprep.subr.mxu0 %v384_v28  ;;  %772 = vmatprep.subr.mxu1 %v386_v29  ;;  %v368_v44 = vld [vmem:[#allocation5 + $0x88] sm:$0xff]  ;;  %v370_v45 = vld [vmem:[#allocation5 + $0x98] sm:$0xff]  ;;  %v367_v46 = vld [vmem:[#allocation5 + $0x80] sm:$0xff] }
  0x67   : > { %516 = vmatpush1.msra.mxu0 %v383_v30  ;;  %773 = vmatpush1.msra.mxu1 %v385_v31  ;;  %v369_v47 = vld [vmem:[#allocation5 + $0x90] sm:$0xff]  ;;  %v364_v48 = vld [vmem:[#allocation5 + $0x68] sm:$0xff]  ;;  %v366_v49 = vld [vmem:[#allocation5 + $0x78] sm:$0xff] }
  0x68   : > { %517 = vmatprep.subr.mxu0 %v380_v32  ;;  %774 = vmatprep.subr.mxu1 %v382_v33  ;;  %v363_v50 = vld [vmem:[#allocation5 + $0x60] sm:$0xff]  ;;  %v365_v51 = vld [vmem:[#allocation5 + $0x70] sm:$0xff]  ;;  %v360_v52 = vld [vmem:[#allocation5 + $0x48] sm:$0xff] }
  0x69   : > { %518 = vmatpush1.msra.mxu0 %v379_v34  ;;  %775 = vmatpush1.msra.mxu1 %v381_v35  ;;  %v362_v53 = vld [vmem:[#allocation5 + $0x58] sm:$0xff]  ;;  %v359_v54 = vld [vmem:[#allocation5 + $0x40] sm:$0xff]  ;;  %v361_v55 = vld [vmem:[#allocation5 + $0x50] sm:$0xff] }
  0x6a   : > { %519 = vmatprep.subr.mxu0 %v376_v36  ;;  %776 = vmatprep.subr.mxu1 %v378_v37  ;;  %v356_v56 = vld [vmem:[#allocation5 + $0x28] sm:$0xff]  ;;  %v358_v57 = vld [vmem:[#allocation5 + $0x38] sm:$0xff]  ;;  %v355_v58 = vld [vmem:[#allocation5 + $0x20] sm:$0xff] }
  0x6b   : > { %520 = vmatpush1.msra.mxu0 %v375_v38  ;;  %777 = vmatpush1.msra.mxu1 %v377_v39  ;;  %v357_v59 = vld [vmem:[#allocation5 + $0x30] sm:$0xff]  ;;  %v352_v60 = vld [vmem:[#allocation5 + $0x8] sm:$0xff]  ;;  %v354_v61 = vld [vmem:[#allocation5 + $0x18] sm:$0xff] }
  0x6c   : > { %521 = vmatprep.subr.mxu0 %v372_v40  ;;  %778 = vmatprep.subr.mxu1 %v374_v41  ;;  %v351_v62 = vld [vmem:[#allocation5] sm:$0xff]  ;;  %v353_v63 = vld [vmem:[#allocation5 + $0x10] sm:$0xff]  ;;  %v476_v0 = vld [vmem:[#allocation5 + $0x3e8] sm:$0xff] }
  0x6d   : > { %522 = vmatpush1.msra.mxu0 %v371_v42  ;;  %779 = vmatpush1.msra.mxu1 %v373_v43  ;;  %v478_v1 = vld [vmem:[#allocation5 + $0x3f8] sm:$0xff]  ;;  %v475_v2 = vld [vmem:[#allocation5 + $0x3e0] sm:$0xff]  ;;  %v477_v3 = vld [vmem:[#allocation5 + $0x3f0] sm:$0xff] }
  0x6e   : > { %523 = vmatprep.subr.mxu0 %v368_v44  ;;  %780 = vmatprep.subr.mxu1 %v370_v45  ;;  %v472_v4 = vld [vmem:[#allocation5 + $0x3c8] sm:$0xff]  ;;  %v474_v5 = vld [vmem:[#allocation5 + $0x3d8] sm:$0xff]  ;;  %v471_v6 = vld [vmem:[#allocation5 + $0x3c0] sm:$0xff] }
  0x6f   : > { %524 = vmatpush1.msra.mxu0 %v367_v46  ;;  %781 = vmatpush1.msra.mxu1 %v369_v47  ;;  %v473_v7 = vld [vmem:[#allocation5 + $0x3d0] sm:$0xff]  ;;  %v468_v8 = vld [vmem:[#allocation5 + $0x3a8] sm:$0xff]  ;;  %v470_v9 = vld [vmem:[#allocation5 + $0x3b8] sm:$0xff] }
  0x70   : > { %525 = vmatprep.subr.mxu0 %v364_v48  ;;  %782 = vmatprep.subr.mxu1 %v366_v49  ;;  %v467_v10 = vld [vmem:[#allocation5 + $0x3a0] sm:$0xff]  ;;  %v469_v11 = vld [vmem:[#allocation5 + $0x3b0] sm:$0xff]  ;;  %v464_v12 = vld [vmem:[#allocation5 + $0x388] sm:$0xff] }
  0x71   : > { %526 = vmatpush1.msra.mxu0 %v363_v50  ;;  %783 = vmatpush1.msra.mxu1 %v365_v51  ;;  %v466_v13 = vld [vmem:[#allocation5 + $0x398] sm:$0xff]  ;;  %v463_v14 = vld [vmem:[#allocation5 + $0x380] sm:$0xff]  ;;  %v465_v15 = vld [vmem:[#allocation5 + $0x390] sm:$0xff] }
  0x72   : > { %527 = vmatprep.subr.mxu0 %v360_v52  ;;  %784 = vmatprep.subr.mxu1 %v362_v53  ;;  %v460_v16 = vld [vmem:[#allocation5 + $0x368] sm:$0xff]  ;;  %v462_v17 = vld [vmem:[#allocation5 + $0x378] sm:$0xff]  ;;  %v459_v18 = vld [vmem:[#allocation5 + $0x360] sm:$0xff] }
  0x73   : > { %528 = vmatpush1.msra.mxu0 %v359_v54  ;;  %785 = vmatpush1.msra.mxu1 %v361_v55  ;;  %v461_v19 = vld [vmem:[#allocation5 + $0x370] sm:$0xff]  ;;  %v456_v20 = vld [vmem:[#allocation5 + $0x348] sm:$0xff]  ;;  %v458_v21 = vld [vmem:[#allocation5 + $0x358] sm:$0xff] }
  0x74   : > { %529 = vmatprep.subr.mxu0 %v356_v56  ;;  %786 = vmatprep.subr.mxu1 %v358_v57  ;;  %v455_v22 = vld [vmem:[#allocation5 + $0x340] sm:$0xff]  ;;  %v457_v23 = vld [vmem:[#allocation5 + $0x350] sm:$0xff]  ;;  %v452_v24 = vld [vmem:[#allocation5 + $0x328] sm:$0xff] }
  0x75   : > { %530 = vmatpush1.msra.mxu0 %v355_v58  ;;  %787 = vmatpush1.msra.mxu1 %v357_v59  ;;  %v454_v25 = vld [vmem:[#allocation5 + $0x338] sm:$0xff]  ;;  %v451_v26 = vld [vmem:[#allocation5 + $0x320] sm:$0xff]  ;;  %v453_v27 = vld [vmem:[#allocation5 + $0x330] sm:$0xff] }
  0x76   : > { %531 = vmatprep.subr.mxu0 %v352_v60  ;;  %788 = vmatprep.subr.mxu1 %v354_v61  ;;  %v448_v28 = vld [vmem:[#allocation5 + $0x308] sm:$0xff]  ;;  %v450_v29 = vld [vmem:[#allocation5 + $0x318] sm:$0xff]  ;;  %v447_v30 = vld [vmem:[#allocation5 + $0x300] sm:$0xff] }
  0x77   : > { %532 = vmatpush1.msra.mxu0 %v351_v62  ;;  %789 = vmatpush1.msra.mxu1 %v353_v63  ;;  %v449_v31 = vld [vmem:[#allocation5 + $0x310] sm:$0xff]  ;;  %v444_v32 = vld [vmem:[#allocation5 + $0x2e8] sm:$0xff]  ;;  %v446_v33 = vld [vmem:[#allocation5 + $0x2f8] sm:$0xff] }
  0x78   : > { %533 = vmatprep.subr.mxu0 %v476_v0  ;;  %790 = vmatprep.subr.mxu1 %v478_v1  ;;  %v443_v34 = vld [vmem:[#allocation5 + $0x2e0] sm:$0xff]  ;;  %v445_v35 = vld [vmem:[#allocation5 + $0x2f0] sm:$0xff]  ;;  %v440_v36 = vld [vmem:[#allocation5 + $0x2c8] sm:$0xff] }
  0x79   : > { %534 = vmatpush2.msra.mxu0 %v475_v2  ;;  %791 = vmatpush2.msra.mxu1 %v477_v3  ;;  %v442_v37 = vld [vmem:[#allocation5 + $0x2d8] sm:$0xff]  ;;  %v439_v38 = vld [vmem:[#allocation5 + $0x2c0] sm:$0xff]  ;;  %v441_v39 = vld [vmem:[#allocation5 + $0x2d0] sm:$0xff] }
  0x7a   : > { %535 = vmatprep.subr.mxu0 %v472_v4  ;;  %792 = vmatprep.subr.mxu1 %v474_v5  ;;  %v436_v40 = vld [vmem:[#allocation5 + $0x2a8] sm:$0xff]  ;;  %v438_v41 = vld [vmem:[#allocation5 + $0x2b8] sm:$0xff]  ;;  %v435_v42 = vld [vmem:[#allocation5 + $0x2a0] sm:$0xff] }
  0x7b   : > { %536 = vmatpush2.msra.mxu0 %v471_v6  ;;  %793 = vmatpush2.msra.mxu1 %v473_v7  ;;  %v437_v43 = vld [vmem:[#allocation5 + $0x2b0] sm:$0xff]  ;;  %v432_v44 = vld [vmem:[#allocation5 + $0x288] sm:$0xff]  ;;  %v434_v45 = vld [vmem:[#allocation5 + $0x298] sm:$0xff] }
  0x7c   : > { %537 = vmatprep.subr.mxu0 %v468_v8  ;;  %794 = vmatprep.subr.mxu1 %v470_v9  ;;  %v431_v46 = vld [vmem:[#allocation5 + $0x280] sm:$0xff]  ;;  %v433_v47 = vld [vmem:[#allocation5 + $0x290] sm:$0xff]  ;;  %v428_v48 = vld [vmem:[#allocation5 + $0x268] sm:$0xff] }
  0x7d   : > { %538 = vmatpush2.msra.mxu0 %v467_v10  ;;  %795 = vmatpush2.msra.mxu1 %v469_v11  ;;  %v430_v49 = vld [vmem:[#allocation5 + $0x278] sm:$0xff]  ;;  %v427_v50 = vld [vmem:[#allocation5 + $0x260] sm:$0xff]  ;;  %v429_v51 = vld [vmem:[#allocation5 + $0x270] sm:$0xff] }
  0x7e   : > { %539 = vmatprep.subr.mxu0 %v464_v12  ;;  %796 = vmatprep.subr.mxu1 %v466_v13  ;;  %v424_v52 = vld [vmem:[#allocation5 + $0x248] sm:$0xff]  ;;  %v426_v53 = vld [vmem:[#allocation5 + $0x258] sm:$0xff]  ;;  %v423_v54 = vld [vmem:[#allocation5 + $0x240] sm:$0xff] }
  0x7f   : > { %540 = vmatpush2.msra.mxu0 %v463_v14  ;;  %797 = vmatpush2.msra.mxu1 %v465_v15  ;;  %v425_v55 = vld [vmem:[#allocation5 + $0x250] sm:$0xff]  ;;  %v420_v56 = vld [vmem:[#allocation5 + $0x228] sm:$0xff]  ;;  %v422_v57 = vld [vmem:[#allocation5 + $0x238] sm:$0xff] }
  0x80   : > { %541 = vmatprep.subr.mxu0 %v460_v16  ;;  %798 = vmatprep.subr.mxu1 %v462_v17  ;;  %v419_v58 = vld [vmem:[#allocation5 + $0x220] sm:$0xff]  ;;  %v421_v59 = vld [vmem:[#allocation5 + $0x230] sm:$0xff]  ;;  %v416_v60 = vld [vmem:[#allocation5 + $0x208] sm:$0xff] }
  0x81   : > { %542 = vmatpush2.msra.mxu0 %v459_v18  ;;  %799 = vmatpush2.msra.mxu1 %v461_v19  ;;  %v418_v61 = vld [vmem:[#allocation5 + $0x218] sm:$0xff]  ;;  %v415_v62 = vld [vmem:[#allocation5 + $0x200] sm:$0xff]  ;;  %v288_v63 = vld [vmem:[%s2611_s15 + $0x8] sm:$0xff] }
  0x82   : > { %543 = vmatprep.subr.mxu0 %v456_v20  ;;  %800 = vmatprep.subr.mxu1 %v458_v21  ;;  %v417_v0 = vld [vmem:[#allocation5 + $0x210] sm:$0xff]  ;;  %v287_v1 = vld [vmem:[%s2611_s15] sm:$0xff]  ;;  %v290_v2 = vld [vmem:[%s2611_s15 + $0x18] sm:$0xff] }
  0x83   : > { %544 = vmatpush2.msra.mxu0 %v455_v22  ;;  %801 = vmatpush2.msra.mxu1 %v457_v23  ;;  %v1302_v3 = vld [vmem:[#allocation7 + $0xf8] sm:$0xff]  ;;  %v1301_v5 = vld [vmem:[#allocation7 + $0xf0] sm:$0xff]  ;;  %v292_v8 = vld [vmem:[%s2611_s15 + $0x28] sm:$0xff] }
  0x84   : > { %545 = vmatprep.subr.mxu0 %v452_v24  ;;  %802 = vmatprep.subr.mxu1 %v454_v25  ;;  %v1366_v4 = vld [vmem:[#allocation7 + $0x2f8] sm:$0xff]  ;;  %v1365_v6 = vld [vmem:[#allocation7 + $0x2f0] sm:$0xff]  ;;  %v1300_v9 = vld [vmem:[#allocation7 + $0xe8] sm:$0xff] }
  0x85   : > { %546 = vmatpush2.msra.mxu0 %v451_v26  ;;  %803 = vmatpush2.msra.mxu1 %v453_v27  ;;  %v289_v7 = vld [vmem:[%s2611_s15 + $0x10] sm:$0xff]  ;;  %v1364_v10 = vld [vmem:[#allocation7 + $0x2e8] sm:$0xff]  ;;  %v1299_v11 = vld [vmem:[#allocation7 + $0xe0] sm:$0xff] }
  0x86   : > { %547 = vmatprep.subr.mxu0 %v448_v28  ;;  %804 = vmatprep.subr.mxu1 %v450_v29  ;;  %v1363_v12 = vld [vmem:[#allocation7 + $0x2e0] sm:$0xff]  ;;  %v294_v14 = vld [vmem:[%s2611_s15 + $0x38] sm:$0xff]  ;;  %v1297_v17 = vld [vmem:[#allocation7 + $0xd0] sm:$0xff] }
  0x87   : > { %548 = vmatpush2.msra.mxu0 %v447_v30  ;;  %805 = vmatpush2.msra.mxu1 %v449_v31  ;;  %v291_v13 = vld [vmem:[%s2611_s15 + $0x20] sm:$0xff]  ;;  %v1298_v15 = vld [vmem:[#allocation7 + $0xd8] sm:$0xff]  ;;  %v1361_v18 = vld [vmem:[#allocation7 + $0x2d0] sm:$0xff] }
  0x88   : > { %549 = vmatprep.subr.mxu0 %v444_v32  ;;  %806 = vmatprep.subr.mxu1 %v446_v33  ;;  %v1362_v16 = vld [vmem:[#allocation7 + $0x2d8] sm:$0xff]  ;;  %v293_v19 = vld [vmem:[%s2611_s15 + $0x30] sm:$0xff]  ;;  %v296_v20 = vld [vmem:[%s2611_s15 + $0x48] sm:$0xff] }
  0x89   : > { %550 = vmatpush2.msra.mxu0 %v443_v34  ;;  %807 = vmatpush2.msra.mxu1 %v445_v35  ;;  %v1296_v21 = vld [vmem:[#allocation7 + $0xc8] sm:$0xff]  ;;  %v1295_v23 = vld [vmem:[#allocation7 + $0xc0] sm:$0xff]  ;;  %v298_v26 = vld [vmem:[%s2611_s15 + $0x58] sm:$0xff] }
  0x8a   : > { %551 = vmatprep.subr.mxu0 %v440_v36  ;;  %808 = vmatprep.subr.mxu1 %v442_v37  ;;  %v1360_v22 = vld [vmem:[#allocation7 + $0x2c8] sm:$0xff]  ;;  %v1359_v24 = vld [vmem:[#allocation7 + $0x2c0] sm:$0xff]  ;;  %v1294_v27 = vld [vmem:[#allocation7 + $0xb8] sm:$0xff] }
  0x8b   : > { %552 = vmatpush2.msra.mxu0 %v439_v38  ;;  %809 = vmatpush2.msra.mxu1 %v441_v39  ;;  %v295_v25 = vld [vmem:[%s2611_s15 + $0x40] sm:$0xff]  ;;  %v1358_v28 = vld [vmem:[#allocation7 + $0x2b8] sm:$0xff]  ;;  %v1293_v29 = vld [vmem:[#allocation7 + $0xb0] sm:$0xff] }
  0x8c   : > { %553 = vmatprep.subr.mxu0 %v436_v40  ;;  %810 = vmatprep.subr.mxu1 %v438_v41  ;;  %v1357_v30 = vld [vmem:[#allocation7 + $0x2b0] sm:$0xff]  ;;  %v300_v32 = vld [vmem:[%s2611_s15 + $0x68] sm:$0xff]  ;;  %v1291_v35 = vld [vmem:[#allocation7 + $0xa0] sm:$0xff] }
  0x8d   : > { %554 = vmatpush2.msra.mxu0 %v435_v42  ;;  %811 = vmatpush2.msra.mxu1 %v437_v43  ;;  %v297_v31 = vld [vmem:[%s2611_s15 + $0x50] sm:$0xff]  ;;  %v1292_v33 = vld [vmem:[#allocation7 + $0xa8] sm:$0xff]  ;;  %v1355_v36 = vld [vmem:[#allocation7 + $0x2a0] sm:$0xff] }
  0x8e   : > { %555 = vmatprep.subr.mxu0 %v432_v44  ;;  %812 = vmatprep.subr.mxu1 %v434_v45  ;;  %v1356_v34 = vld [vmem:[#allocation7 + $0x2a8] sm:$0xff]  ;;  %v299_v37 = vld [vmem:[%s2611_s15 + $0x60] sm:$0xff]  ;;  %v302_v38 = vld [vmem:[%s2611_s15 + $0x78] sm:$0xff] }
  0x8f   : > { %556 = vmatpush2.msra.mxu0 %v431_v46  ;;  %813 = vmatpush2.msra.mxu1 %v433_v47  ;;  %v1290_v39 = vld [vmem:[#allocation7 + $0x98] sm:$0xff]  ;;  %v1289_v41 = vld [vmem:[#allocation7 + $0x90] sm:$0xff]  ;;  %v304_v44 = vld [vmem:[%s2611_s15 + $0x88] sm:$0xff] }
  0x90   : > { %557 = vmatprep.subr.mxu0 %v428_v48  ;;  %814 = vmatprep.subr.mxu1 %v430_v49  ;;  %v1354_v40 = vld [vmem:[#allocation7 + $0x298] sm:$0xff]  ;;  %v1353_v42 = vld [vmem:[#allocation7 + $0x290] sm:$0xff]  ;;  %v1288_v45 = vld [vmem:[#allocation7 + $0x88] sm:$0xff] }
  0x91   : > { %558 = vmatpush2.msra.mxu0 %v427_v50  ;;  %815 = vmatpush2.msra.mxu1 %v429_v51  ;;  %v301_v43 = vld [vmem:[%s2611_s15 + $0x70] sm:$0xff]  ;;  %v1352_v46 = vld [vmem:[#allocation7 + $0x288] sm:$0xff]  ;;  %v1287_v47 = vld [vmem:[#allocation7 + $0x80] sm:$0xff] }
  0x92   : > { %559 = vmatprep.subr.mxu0 %v424_v52  ;;  %816 = vmatprep.subr.mxu1 %v426_v53  ;;  %v1351_v48 = vld [vmem:[#allocation7 + $0x280] sm:$0xff]  ;;  %v306_v50 = vld [vmem:[%s2611_s15 + $0x98] sm:$0xff]  ;;  %v1285_v53 = vld [vmem:[#allocation7 + $0x70] sm:$0xff] }
  0x93   : > { %560 = vmatpush2.msra.mxu0 %v423_v54  ;;  %817 = vmatpush2.msra.mxu1 %v425_v55  ;;  %v303_v49 = vld [vmem:[%s2611_s15 + $0x80] sm:$0xff]  ;;  %v1286_v51 = vld [vmem:[#allocation7 + $0x78] sm:$0xff]  ;;  %v1349_v54 = vld [vmem:[#allocation7 + $0x270] sm:$0xff] }
  0x94   : > { %561 = vmatprep.subr.mxu0 %v420_v56  ;;  %818 = vmatprep.subr.mxu1 %v422_v57  ;;  %v1350_v52 = vld [vmem:[#allocation7 + $0x278] sm:$0xff]  ;;  %v305_v55 = vld [vmem:[%s2611_s15 + $0x90] sm:$0xff]  ;;  %v308_v56 = vld [vmem:[%s2611_s15 + $0xa8] sm:$0xff] }
  0x95   : > { %562 = vmatpush2.msra.mxu0 %v419_v58  ;;  %819 = vmatpush2.msra.mxu1 %v421_v59  ;;  %v1284_v57 = vld [vmem:[#allocation7 + $0x68] sm:$0xff]  ;;  %v1283_v59 = vld [vmem:[#allocation7 + $0x60] sm:$0xff] }
  0x96   : > { %563 = vmatprep.subr.mxu0 %v416_v60  ;;  %820 = vmatprep.subr.mxu1 %v418_v61  ;;  %v1348_v58 = vld [vmem:[#allocation7 + $0x268] sm:$0xff]  ;;  %v1347_v60 = vld [vmem:[#allocation7 + $0x260] sm:$0xff] }
  0x97   : > { %564 = vmatpush2.msra.mxu0 %v415_v62  ;;  %565 = vmatprep.mubr.f32.mxu0 %v288_v63  ;;  %v307_v61 = vld [vmem:[%s2611_s15 + $0xa0] sm:$0xff]  ;;  %v310_v62 = vld [vmem:[%s2611_s15 + $0xb8] sm:$0xff] }
  0x98   : > { %821 = vmatpush2.msra.mxu1 %v417_v0  ;;  %822 = vmatprep.mubr.f32.mxu1 %v288_v63  ;;  %v1282_v63 = vld [vmem:[#allocation7 + $0x58] sm:$0xff] }
  0x99   : > { %566 = vmatmul.mubr.f32.vlgmr.msra.gmra.mxu0 %v287_v1  ;;  %823 = vmatmul.mubr.f32.vlgmr.msra.gmra.mxu1 %v287_v1  ;;  %v1346_v0 = vld [vmem:[#allocation7 + $0x258] sm:$0xff]  ;;  %v1281_v1 = vld [vmem:[#allocation7 + $0x50] sm:$0xff] }
  0x9a   : > { %571 = vmatprep.mubr.f32.mxu0 %v290_v2  ;;  %828 = vmatprep.mubr.f32.mxu1 %v290_v2  ;;  %v1345_v2 = vld [vmem:[#allocation7 + $0x250] sm:$0xff] }
  0x9b   : > { %1399 = vmatprep.subr.mxu0 %v1302_v3  ;;  %1656 = vmatprep.subr.mxu1 %v1366_v4  ;;  %v309_v3 = vld [vmem:[%s2611_s15 + $0xb0] sm:$0xff]  ;;  %v312_v4 = vld [vmem:[%s2611_s15 + $0xc8] sm:$0xff] }
  0x9c   : > { %1400 = vmatpush1.msra.mxu0 %v1301_v5  ;;  %1657 = vmatpush1.msra.mxu1 %v1365_v6  ;;  %v1280_v5 = vld [vmem:[#allocation7 + $0x48] sm:$0xff] }
  0x9d   : > { %572 = vmatmul.mubr.f32.gmra.mxu0 %v289_v7  ;;  %829 = vmatmul.mubr.f32.gmra.mxu1 %v289_v7  ;;  %v1344_v6 = vld [vmem:[#allocation7 + $0x248] sm:$0xff]  ;;  %v1279_v7 = vld [vmem:[#allocation7 + $0x40] sm:$0xff] }
  0x9e   : > { %577 = vmatprep.mubr.f32.mxu0 %v292_v8  ;;  %834 = vmatprep.mubr.f32.mxu1 %v292_v8  ;;  %v1343_v8 = vld [vmem:[#allocation7 + $0x240] sm:$0xff] }
  0x9f   : > { %1401 = vmatprep.subr.mxu0 %v1300_v9  ;;  %1658 = vmatprep.subr.mxu1 %v1364_v10  ;;  %v311_v9 = vld [vmem:[%s2611_s15 + $0xc0] sm:$0xff]  ;;  %v314_v10 = vld [vmem:[%s2611_s15 + $0xd8] sm:$0xff] }
  0xa0   : > { %1402 = vmatpush1.msra.mxu0 %v1299_v11  ;;  %1659 = vmatpush1.msra.mxu1 %v1363_v12  ;;  %v1278_v11 = vld [vmem:[#allocation7 + $0x38] sm:$0xff] }
  0xa1   : > { %578 = vmatmul.mubr.f32.gmra.mxu0 %v291_v13  ;;  %835 = vmatmul.mubr.f32.gmra.mxu1 %v291_v13  ;;  %v1342_v12 = vld [vmem:[#allocation7 + $0x238] sm:$0xff]  ;;  %v1277_v13 = vld [vmem:[#allocation7 + $0x30] sm:$0xff] }
  0xa2   : > { %583 = vmatprep.mubr.f32.mxu0 %v294_v14  ;;  %840 = vmatprep.mubr.f32.mxu1 %v294_v14  ;;  %v1341_v14 = vld [vmem:[#allocation7 + $0x230] sm:$0xff] }
  0xa3   : > { %1403 = vmatprep.subr.mxu0 %v1298_v15  ;;  %1660 = vmatprep.subr.mxu1 %v1362_v16  ;;  %v313_v15 = vld [vmem:[%s2611_s15 + $0xd0] sm:$0xff]  ;;  %v316_v16 = vld [vmem:[%s2611_s15 + $0xe8] sm:$0xff] }
  0xa4   : > { %1404 = vmatpush1.msra.mxu0 %v1297_v17  ;;  %1661 = vmatpush1.msra.mxu1 %v1361_v18  ;;  %v1276_v17 = vld [vmem:[#allocation7 + $0x28] sm:$0xff] }
  0xa5   : > { %584 = vmatmul.mubr.f32.gmra.mxu0 %v293_v19  ;;  %841 = vmatmul.mubr.f32.gmra.mxu1 %v293_v19  ;;  %v1340_v18 = vld [vmem:[#allocation7 + $0x228] sm:$0xff]  ;;  %v1275_v19 = vld [vmem:[#allocation7 + $0x20] sm:$0xff] }
  0xa6   : > { %589 = vmatprep.mubr.f32.mxu0 %v296_v20  ;;  %846 = vmatprep.mubr.f32.mxu1 %v296_v20  ;;  %v1339_v20 = vld [vmem:[#allocation7 + $0x220] sm:$0xff] }
  0xa7   : > { %1405 = vmatprep.subr.mxu0 %v1296_v21  ;;  %1662 = vmatprep.subr.mxu1 %v1360_v22  ;;  %v315_v21 = vld [vmem:[%s2611_s15 + $0xe0] sm:$0xff]  ;;  %v318_v22 = vld [vmem:[%s2611_s15 + $0xf8] sm:$0xff] }
  0xa8   : > { %1406 = vmatpush1.msra.mxu0 %v1295_v23  ;;  %1663 = vmatpush1.msra.mxu1 %v1359_v24  ;;  %v1274_v23 = vld [vmem:[#allocation7 + $0x18] sm:$0xff] }
  0xa9   : > { %590 = vmatmul.mubr.f32.gmra.mxu0 %v295_v25  ;;  %847 = vmatmul.mubr.f32.gmra.mxu1 %v295_v25  ;;  %v1338_v24 = vld [vmem:[#allocation7 + $0x218] sm:$0xff]  ;;  %v1273_v25 = vld [vmem:[#allocation7 + $0x10] sm:$0xff] }
  0xaa   : > { %595 = vmatprep.mubr.f32.mxu0 %v298_v26  ;;  %852 = vmatprep.mubr.f32.mxu1 %v298_v26  ;;  %v1337_v26 = vld [vmem:[#allocation7 + $0x210] sm:$0xff] }
  0xab   : > { %1407 = vmatprep.subr.mxu0 %v1294_v27  ;;  %1664 = vmatprep.subr.mxu1 %v1358_v28  ;;  %v317_v27 = vld [vmem:[%s2611_s15 + $0xf0] sm:$0xff]  ;;  %v320_v28 = vld [vmem:[%s2611_s15 + $0x108] sm:$0xff] }
  0xac   : > { %1408 = vmatpush1.msra.mxu0 %v1293_v29  ;;  %1665 = vmatpush1.msra.mxu1 %v1357_v30  ;;  %v1272_v29 = vld [vmem:[#allocation7 + $0x8] sm:$0xff] }
  0xad   : > { %596 = vmatmul.mubr.f32.gmra.mxu0 %v297_v31  ;;  %853 = vmatmul.mubr.f32.gmra.mxu1 %v297_v31  ;;  %v1336_v30 = vld [vmem:[#allocation7 + $0x208] sm:$0xff]  ;;  %v1271_v31 = vld [vmem:[#allocation7] sm:$0xff] }
  0xae   : > { %601 = vmatprep.mubr.f32.mxu0 %v300_v32  ;;  %858 = vmatprep.mubr.f32.mxu1 %v300_v32  ;;  %v1335_v32 = vld [vmem:[#allocation7 + $0x200] sm:$0xff] }
  0xaf   : > { %1409 = vmatprep.subr.mxu0 %v1292_v33  ;;  %1666 = vmatprep.subr.mxu1 %v1356_v34  ;;  %v319_v33 = vld [vmem:[%s2611_s15 + $0x100] sm:$0xff]  ;;  %v322_v34 = vld [vmem:[%s2611_s15 + $0x118] sm:$0xff] }
  0xb0   : > { %1410 = vmatpush1.msra.mxu0 %v1291_v35  ;;  %1667 = vmatpush1.msra.mxu1 %v1355_v36  ;;  %v1334_v35 = vld [vmem:[#allocation7 + $0x1f8] sm:$0xff] }
  0xb1   : > { %602 = vmatmul.mubr.f32.gmra.mxu0 %v299_v37  ;;  %859 = vmatmul.mubr.f32.gmra.mxu1 %v299_v37  ;;  %v1398_v36 = vld [vmem:[#allocation7 + $0x3f8] sm:$0xff]  ;;  %v1333_v37 = vld [vmem:[#allocation7 + $0x1f0] sm:$0xff] }
  0xb2   : > { %607 = vmatprep.mubr.f32.mxu0 %v302_v38  ;;  %864 = vmatprep.mubr.f32.mxu1 %v302_v38  ;;  %v1397_v38 = vld [vmem:[#allocation7 + $0x3f0] sm:$0xff] }
  0xb3   : > { %1411 = vmatprep.subr.mxu0 %v1290_v39  ;;  %1668 = vmatprep.subr.mxu1 %v1354_v40  ;;  %v321_v39 = vld [vmem:[%s2611_s15 + $0x110] sm:$0xff]  ;;  %v324_v40 = vld [vmem:[%s2611_s15 + $0x128] sm:$0xff] }
  0xb4   : > { %1412 = vmatpush1.msra.mxu0 %v1289_v41  ;;  %1669 = vmatpush1.msra.mxu1 %v1353_v42  ;;  %v1332_v41 = vld [vmem:[#allocation7 + $0x1e8] sm:$0xff] }
  0xb5   : > { %608 = vmatmul.mubr.f32.gmra.mxu0 %v301_v43  ;;  %865 = vmatmul.mubr.f32.gmra.mxu1 %v301_v43  ;;  %v1396_v42 = vld [vmem:[#allocation7 + $0x3e8] sm:$0xff]  ;;  %v1331_v43 = vld [vmem:[#allocation7 + $0x1e0] sm:$0xff] }
  0xb6   : > { %613 = vmatprep.mubr.f32.mxu0 %v304_v44  ;;  %870 = vmatprep.mubr.f32.mxu1 %v304_v44  ;;  %v1395_v44 = vld [vmem:[#allocation7 + $0x3e0] sm:$0xff] }
  0xb7   : > { %1413 = vmatprep.subr.mxu0 %v1288_v45  ;;  %1670 = vmatprep.subr.mxu1 %v1352_v46  ;;  %v323_v45 = vld [vmem:[%s2611_s15 + $0x120] sm:$0xff]  ;;  %v326_v46 = vld [vmem:[%s2611_s15 + $0x138] sm:$0xff] }
  0xb8   : > { %1414 = vmatpush1.msra.mxu0 %v1287_v47  ;;  %1671 = vmatpush1.msra.mxu1 %v1351_v48  ;;  %v1330_v47 = vld [vmem:[#allocation7 + $0x1d8] sm:$0xff] }
  0xb9   : > { %614 = vmatmul.mubr.f32.gmra.mxu0 %v303_v49  ;;  %871 = vmatmul.mubr.f32.gmra.mxu1 %v303_v49  ;;  %v1394_v48 = vld [vmem:[#allocation7 + $0x3d8] sm:$0xff]  ;;  %v1329_v49 = vld [vmem:[#allocation7 + $0x1d0] sm:$0xff] }
  0xba   : > { %619 = vmatprep.mubr.f32.mxu0 %v306_v50  ;;  %876 = vmatprep.mubr.f32.mxu1 %v306_v50  ;;  %v1393_v50 = vld [vmem:[#allocation7 + $0x3d0] sm:$0xff] }
  0xbb   : > { %1415 = vmatprep.subr.mxu0 %v1286_v51  ;;  %1672 = vmatprep.subr.mxu1 %v1350_v52  ;;  %v325_v51 = vld [vmem:[%s2611_s15 + $0x130] sm:$0xff]  ;;  %v328_v52 = vld [vmem:[%s2611_s15 + $0x148] sm:$0xff] }
  0xbc   : > { %1416 = vmatpush1.msra.mxu0 %v1285_v53  ;;  %1673 = vmatpush1.msra.mxu1 %v1349_v54  ;;  %v1328_v53 = vld [vmem:[#allocation7 + $0x1c8] sm:$0xff] }
  0xbd   : > { %620 = vmatmul.mubr.f32.gmra.mxu0 %v305_v55  ;;  %877 = vmatmul.mubr.f32.gmra.mxu1 %v305_v55  ;;  %v1392_v54 = vld [vmem:[#allocation7 + $0x3c8] sm:$0xff]  ;;  %v1327_v55 = vld [vmem:[#allocation7 + $0x1c0] sm:$0xff] }
  0xbe   : > { %625 = vmatprep.mubr.f32.mxu0 %v308_v56  ;;  %882 = vmatprep.mubr.f32.mxu1 %v308_v56  ;;  %v1391_v56 = vld [vmem:[#allocation7 + $0x3c0] sm:$0xff] }
  0xbf   : > { %1417 = vmatprep.subr.mxu0 %v1284_v57  ;;  %1674 = vmatprep.subr.mxu1 %v1348_v58  ;;  %v327_v57 = vld [vmem:[%s2611_s15 + $0x140] sm:$0xff]  ;;  %v330_v58 = vld [vmem:[%s2611_s15 + $0x158] sm:$0xff] }
  0xc0   : > { %1418 = vmatpush1.msra.mxu0 %v1283_v59  ;;  %1675 = vmatpush1.msra.mxu1 %v1347_v60  ;;  %v1326_v59 = vld [vmem:[#allocation7 + $0x1b8] sm:$0xff] }
  0xc1   : > { %626 = vmatmul.mubr.f32.gmra.mxu0 %v307_v61  ;;  %883 = vmatmul.mubr.f32.gmra.mxu1 %v307_v61  ;;  %v1390_v60 = vld [vmem:[#allocation7 + $0x3b8] sm:$0xff]  ;;  %v1325_v61 = vld [vmem:[#allocation7 + $0x1b0] sm:$0xff] }
  0xc2   : > { %631 = vmatprep.mubr.f32.mxu0 %v310_v62  ;;  %888 = vmatprep.mubr.f32.mxu1 %v310_v62  ;;  %v1389_v62 = vld [vmem:[#allocation7 + $0x3b0] sm:$0xff] }
  0xc3   : > { %1419 = vmatprep.subr.mxu0 %v1282_v63  ;;  %1676 = vmatprep.subr.mxu1 %v1346_v0  ;;  %v329_v63 = vld [vmem:[%s2611_s15 + $0x150] sm:$0xff]  ;;  %v332_v0 = vld [vmem:[%s2611_s15 + $0x168] sm:$0xff] }
  0xc4   : > { %1420 = vmatpush1.msra.mxu0 %v1281_v1  ;;  %1677 = vmatpush1.msra.mxu1 %v1345_v2  ;;  %v1324_v1 = vld [vmem:[#allocation7 + $0x1a8] sm:$0xff] }
  0xc5   : > { %632 = vmatmul.mubr.f32.gmra.mxu0 %v309_v3  ;;  %889 = vmatmul.mubr.f32.gmra.mxu1 %v309_v3  ;;  %v1388_v2 = vld [vmem:[#allocation7 + $0x3a8] sm:$0xff]  ;;  %v1323_v3 = vld [vmem:[#allocation7 + $0x1a0] sm:$0xff] }
  0xc6   : > { %637 = vmatprep.mubr.f32.mxu0 %v312_v4  ;;  %894 = vmatprep.mubr.f32.mxu1 %v312_v4  ;;  %v1387_v4 = vld [vmem:[#allocation7 + $0x3a0] sm:$0xff] }
  0xc7   : > { %1421 = vmatprep.subr.mxu0 %v1280_v5  ;;  %1678 = vmatprep.subr.mxu1 %v1344_v6  ;;  %v331_v5 = vld [vmem:[%s2611_s15 + $0x160] sm:$0xff]  ;;  %v334_v6 = vld [vmem:[%s2611_s15 + $0x178] sm:$0xff] }
  0xc8   : > { %1422 = vmatpush1.msra.mxu0 %v1279_v7  ;;  %1679 = vmatpush1.msra.mxu1 %v1343_v8  ;;  %v1322_v7 = vld [vmem:[#allocation7 + $0x198] sm:$0xff] }
  0xc9   : > { %638 = vmatmul.mubr.f32.gmra.mxu0 %v311_v9  ;;  %895 = vmatmul.mubr.f32.gmra.mxu1 %v311_v9  ;;  %v1386_v8 = vld [vmem:[#allocation7 + $0x398] sm:$0xff]  ;;  %v1321_v9 = vld [vmem:[#allocation7 + $0x190] sm:$0xff] }
  0xca   : > { %643 = vmatprep.mubr.f32.mxu0 %v314_v10  ;;  %900 = vmatprep.mubr.f32.mxu1 %v314_v10  ;;  %v1385_v10 = vld [vmem:[#allocation7 + $0x390] sm:$0xff] }
  0xcb   : > { %1423 = vmatprep.subr.mxu0 %v1278_v11  ;;  %1680 = vmatprep.subr.mxu1 %v1342_v12  ;;  %v333_v11 = vld [vmem:[%s2611_s15 + $0x170] sm:$0xff]  ;;  %v336_v12 = vld [vmem:[%s2611_s15 + $0x188] sm:$0xff] }
  0xcc   : > { %1424 = vmatpush1.msra.mxu0 %v1277_v13  ;;  %1681 = vmatpush1.msra.mxu1 %v1341_v14  ;;  %v1320_v13 = vld [vmem:[#allocation7 + $0x188] sm:$0xff] }
  0xcd   : > { %644 = vmatmul.mubr.f32.gmra.mxu0 %v313_v15  ;;  %901 = vmatmul.mubr.f32.gmra.mxu1 %v313_v15  ;;  %v1384_v14 = vld [vmem:[#allocation7 + $0x388] sm:$0xff]  ;;  %v1319_v15 = vld [vmem:[#allocation7 + $0x180] sm:$0xff] }
  0xce   : > { %649 = vmatprep.mubr.f32.mxu0 %v316_v16  ;;  %906 = vmatprep.mubr.f32.mxu1 %v316_v16  ;;  %v1383_v16 = vld [vmem:[#allocation7 + $0x380] sm:$0xff] }
  0xcf   : > { %1425 = vmatprep.subr.mxu0 %v1276_v17  ;;  %1682 = vmatprep.subr.mxu1 %v1340_v18  ;;  %v335_v17 = vld [vmem:[%s2611_s15 + $0x180] sm:$0xff]  ;;  %v338_v18 = vld [vmem:[%s2611_s15 + $0x198] sm:$0xff] }
  0xd0   : > { %1426 = vmatpush1.msra.mxu0 %v1275_v19  ;;  %1683 = vmatpush1.msra.mxu1 %v1339_v20  ;;  %v1318_v19 = vld [vmem:[#allocation7 + $0x178] sm:$0xff] }
  0xd1   : > { %650 = vmatmul.mubr.f32.gmra.mxu0 %v315_v21  ;;  %907 = vmatmul.mubr.f32.gmra.mxu1 %v315_v21  ;;  %v1382_v20 = vld [vmem:[#allocation7 + $0x378] sm:$0xff]  ;;  %v1317_v21 = vld [vmem:[#allocation7 + $0x170] sm:$0xff] }
  0xd2   : > { %655 = vmatprep.mubr.f32.mxu0 %v318_v22  ;;  %912 = vmatprep.mubr.f32.mxu1 %v318_v22  ;;  %v1381_v22 = vld [vmem:[#allocation7 + $0x370] sm:$0xff] }
  0xd3   : > { %1427 = vmatprep.subr.mxu0 %v1274_v23  ;;  %1684 = vmatprep.subr.mxu1 %v1338_v24  ;;  %v337_v23 = vld [vmem:[%s2611_s15 + $0x190] sm:$0xff]  ;;  %v340_v24 = vld [vmem:[%s2611_s15 + $0x1a8] sm:$0xff] }
  0xd4   : > { %1428 = vmatpush1.msra.mxu0 %v1273_v25  ;;  %1685 = vmatpush1.msra.mxu1 %v1337_v26  ;;  %v1316_v25 = vld [vmem:[#allocation7 + $0x168] sm:$0xff] }
  0xd5   : > { %656 = vmatmul.mubr.f32.gmra.mxu0 %v317_v27  ;;  %913 = vmatmul.mubr.f32.gmra.mxu1 %v317_v27  ;;  %v1380_v26 = vld [vmem:[#allocation7 + $0x368] sm:$0xff]  ;;  %v1315_v27 = vld [vmem:[#allocation7 + $0x160] sm:$0xff] }
  0xd6   : > { %661 = vmatprep.mubr.f32.mxu0 %v320_v28  ;;  %918 = vmatprep.mubr.f32.mxu1 %v320_v28  ;;  %v1379_v28 = vld [vmem:[#allocation7 + $0x360] sm:$0xff] }
  0xd7   : > { %1429 = vmatprep.subr.mxu0 %v1272_v29  ;;  %1686 = vmatprep.subr.mxu1 %v1336_v30  ;;  %v339_v29 = vld [vmem:[%s2611_s15 + $0x1a0] sm:$0xff]  ;;  %v342_v30 = vld [vmem:[%s2611_s15 + $0x1b8] sm:$0xff] }
  0xd8   : > { %1430 = vmatpush1.msra.mxu0 %v1271_v31  ;;  %1687 = vmatpush1.msra.mxu1 %v1335_v32  ;;  %v1314_v31 = vld [vmem:[#allocation7 + $0x158] sm:$0xff] }
  0xd9   : > { %662 = vmatmul.mubr.f32.gmra.mxu0 %v319_v33  ;;  %919 = vmatmul.mubr.f32.gmra.mxu1 %v319_v33  ;;  %v1378_v32 = vld [vmem:[#allocation7 + $0x358] sm:$0xff]  ;;  %v1313_v33 = vld [vmem:[#allocation7 + $0x150] sm:$0xff] }
  0xda   : > { %667 = vmatprep.mubr.f32.mxu0 %v322_v34  ;;  %924 = vmatprep.mubr.f32.mxu1 %v322_v34  ;;  %v1377_v34 = vld [vmem:[#allocation7 + $0x350] sm:$0xff] }
  0xdb   : > { %1431 = vmatprep.subr.mxu0 %v1334_v35  ;;  %1688 = vmatprep.subr.mxu1 %v1398_v36  ;;  %v341_v35 = vld [vmem:[%s2611_s15 + $0x1b0] sm:$0xff]  ;;  %v344_v36 = vld [vmem:[%s2611_s15 + $0x1c8] sm:$0xff] }
  0xdc   : > { %1432 = vmatpush2.msra.mxu0 %v1333_v37  ;;  %1689 = vmatpush2.msra.mxu1 %v1397_v38  ;;  %v1312_v37 = vld [vmem:[#allocation7 + $0x148] sm:$0xff] }
  0xdd   : > { %668 = vmatmul.mubr.f32.gmra.mxu0 %v321_v39  ;;  %925 = vmatmul.mubr.f32.gmra.mxu1 %v321_v39  ;;  %v1376_v38 = vld [vmem:[#allocation7 + $0x348] sm:$0xff]  ;;  %v1311_v39 = vld [vmem:[#allocation7 + $0x140] sm:$0xff] }
  0xde   : > { %673 = vmatprep.mubr.f32.mxu0 %v324_v40  ;;  %930 = vmatprep.mubr.f32.mxu1 %v324_v40  ;;  %v1375_v40 = vld [vmem:[#allocation7 + $0x340] sm:$0xff] }
  0xdf   : > { %1433 = vmatprep.subr.mxu0 %v1332_v41  ;;  %1690 = vmatprep.subr.mxu1 %v1396_v42  ;;  %v343_v41 = vld [vmem:[%s2611_s15 + $0x1c0] sm:$0xff]  ;;  %v346_v42 = vld [vmem:[%s2611_s15 + $0x1d8] sm:$0xff] }
  0xe0   : > { %1434 = vmatpush2.msra.mxu0 %v1331_v43  ;;  %1691 = vmatpush2.msra.mxu1 %v1395_v44  ;;  %v1310_v43 = vld [vmem:[#allocation7 + $0x138] sm:$0xff] }
  0xe1   : > { %674 = vmatmul.mubr.f32.gmra.mxu0 %v323_v45  ;;  %931 = vmatmul.mubr.f32.gmra.mxu1 %v323_v45  ;;  %v1374_v44 = vld [vmem:[#allocation7 + $0x338] sm:$0xff]  ;;  %v1309_v45 = vld [vmem:[#allocation7 + $0x130] sm:$0xff] }
  0xe2   : > { %679 = vmatprep.mubr.f32.mxu0 %v326_v46  ;;  %936 = vmatprep.mubr.f32.mxu1 %v326_v46  ;;  %v1373_v46 = vld [vmem:[#allocation7 + $0x330] sm:$0xff] }
  0xe3   : > { %1435 = vmatprep.subr.mxu0 %v1330_v47  ;;  %1692 = vmatprep.subr.mxu1 %v1394_v48  ;;  %v345_v47 = vld [vmem:[%s2611_s15 + $0x1d0] sm:$0xff]  ;;  %v348_v48 = vld [vmem:[%s2611_s15 + $0x1e8] sm:$0xff] }
  0xe4   : > { %1436 = vmatpush2.msra.mxu0 %v1329_v49  ;;  %1693 = vmatpush2.msra.mxu1 %v1393_v50  ;;  %v1308_v49 = vld [vmem:[#allocation7 + $0x128] sm:$0xff] }
  0xe5   : > { %680 = vmatmul.mubr.f32.gmra.mxu0 %v325_v51  ;;  %937 = vmatmul.mubr.f32.gmra.mxu1 %v325_v51  ;;  %v1372_v50 = vld [vmem:[#allocation7 + $0x328] sm:$0xff]  ;;  %v1307_v51 = vld [vmem:[#allocation7 + $0x120] sm:$0xff] }
  0xe6   : > { %685 = vmatprep.mubr.f32.mxu0 %v328_v52  ;;  %942 = vmatprep.mubr.f32.mxu1 %v328_v52  ;;  %v1371_v52 = vld [vmem:[#allocation7 + $0x320] sm:$0xff] }
  0xe7   : > { %1437 = vmatprep.subr.mxu0 %v1328_v53  ;;  %1694 = vmatprep.subr.mxu1 %v1392_v54  ;;  %v347_v53 = vld [vmem:[%s2611_s15 + $0x1e0] sm:$0xff]  ;;  %v350_v54 = vld [vmem:[%s2611_s15 + $0x1f8] sm:$0xff] }
  0xe8   : > { %1438 = vmatpush2.msra.mxu0 %v1327_v55  ;;  %1695 = vmatpush2.msra.mxu1 %v1391_v56  ;;  %v1306_v55 = vld [vmem:[#allocation7 + $0x118] sm:$0xff] }
  0xe9   : > { %686 = vmatmul.mubr.f32.gmra.mxu0 %v327_v57  ;;  %943 = vmatmul.mubr.f32.gmra.mxu1 %v327_v57  ;;  %v1370_v56 = vld [vmem:[#allocation7 + $0x318] sm:$0xff]  ;;  %v1305_v57 = vld [vmem:[#allocation7 + $0x110] sm:$0xff] }
  0xea   : > { %691 = vmatprep.mubr.f32.mxu0 %v330_v58  ;;  %948 = vmatprep.mubr.f32.mxu1 %v330_v58  ;;  %v1369_v58 = vld [vmem:[#allocation7 + $0x310] sm:$0xff] }
  0xeb   : > { %1439 = vmatprep.subr.mxu0 %v1326_v59  ;;  %1696 = vmatprep.subr.mxu1 %v1390_v60  ;;  %v349_v59 = vld [vmem:[%s2611_s15 + $0x1f0] sm:$0xff]  ;;  %v1304_v60 = vld [vmem:[#allocation7 + $0x108] sm:$0xff]  ;;  %s2333_s15 = sshll.u32 %s2436_s7, 4  ;;  %s2334_s15 = int_to_ptr.vmem [resolvable:$false] %s2333_s15 }
  0xec   : > { %1440 = vmatpush2.msra.mxu0 %v1325_v61  ;;  %1697 = vmatpush2.msra.mxu1 %v1389_v62  ;;  %v1368_v61 = vld [vmem:[#allocation7 + $0x308] sm:$0xff]  ;;  %v1303_v62 = vld [vmem:[#allocation7 + $0x100] sm:$0xff]  ;;  %s2335_s24 = scalar_lea.vmem %s2334_s15, 32768  ;;  %p2336_p6 = scmp.lt.s32.totalorder %s2962_s16, %s2334_s15 }
  0xed   : > { %692 = vmatmul.mubr.f32.gmra.mxu0 %v329_v63  ;;  %949 = vmatmul.mubr.f32.gmra.mxu1 %v329_v63  ;;  %v1367_v63 = vld [vmem:[#allocation7 + $0x300] sm:$0xff]  ;;  %p2337_p12 = scmp.lt.s32.totalorder %s2335_s24, %s2329_s23 }
  0xee   : > { %697 = vmatprep.mubr.f32.mxu0 %v332_v0  ;;  %954 = vmatprep.mubr.f32.mxu1 %v332_v0  ;;  %v481_v0 = vlaneseq }
  0xef   : > { %1441 = vmatprep.subr.mxu0 %v1324_v1  ;;  %1698 = vmatprep.subr.mxu1 %v1388_v2  ;;  %p2338_p3 = por %p2337_p12, %p2336_p6 }
  0xf0   : > { %1442 = vmatpush2.msra.mxu0 %v1323_v3  ;;  %1699 = vmatpush2.msra.mxu1 %v1387_v4  ;;  %v482_v1 = vshrl.u32 %v481_v0, 7  ;;  %v479_v4 = vld [vmem:[%s3107_s2] sm:$0xf] }
  0xf1   : > { %698 = vmatmul.mubr.f32.gmra.mxu0 %v331_v5  ;;  %955 = vmatmul.mubr.f32.gmra.mxu1 %v331_v5  ;;  %p2339_p9 = pnand %p2338_p3, %p2332_p2 }
  0xf2   : > { %703 = vmatprep.mubr.f32.mxu0 %v334_v6  ;;  %960 = vmatprep.mubr.f32.mxu1 %v334_v6  ;;  %v483_v2 = vsub.s32 0, %v482_v1  ;;  %v491_v3 = vsub.s32 2, %v482_v1  ;;  %v487_v5 = vsub.s32 1, %v482_v1  ;;  %v495_v6 = vsub.s32 3, %v482_v1 }
  0xf3   : > { %1443 = vmatprep.subr.mxu0 %v1322_v7  ;;  %1700 = vmatprep.subr.mxu1 %v1386_v8 }
  0xf4   : > { %1444 = vmatpush2.msra.mxu0 %v1321_v9  ;;  %1701 = vmatpush2.msra.mxu1 %v1385_v10  ;;  %v2688_v7 = vrot.slane %v479_v4, %v483_v2  ;;  %v2690_v8 = vrot.slane %v479_v4, %v491_v3  ;;  %v2693_v9 = vrot.slane %v479_v4, %v487_v5 }
  0xf5   : > { %704 = vmatmul.mubr.f32.gmra.mxu0 %v333_v11  ;;  %961 = vmatmul.mubr.f32.gmra.mxu1 %v333_v11  ;;  %v2695_v10 = vrot.slane %v479_v4, %v495_v6 }
  0xf6   : > { %709 = vmatprep.mubr.f32.mxu0 %v336_v12  ;;  %966 = vmatprep.mubr.f32.mxu1 %v336_v12 }
  0xf7   : > { %1445 = vmatprep.subr.mxu0 %v1320_v13  ;;  %1702 = vmatprep.subr.mxu1 %v1384_v14 }
  0xf8   : > { %1446 = vmatpush2.msra.mxu0 %v1319_v15  ;;  %1703 = vmatpush2.msra.mxu1 %v1383_v16 }
  0xf9   : > { %710 = vmatmul.mubr.f32.gmra.mxu0 %v335_v17  ;;  %967 = vmatmul.mubr.f32.gmra.mxu1 %v335_v17 }
  0xfa   : > { %715 = vmatprep.mubr.f32.mxu0 %v338_v18  ;;  %972 = vmatprep.mubr.f32.mxu1 %v338_v18 }
  0xfb   : > { %1447 = vmatprep.subr.mxu0 %v1318_v19  ;;  %1704 = vmatprep.subr.mxu1 %v1382_v20 }
  0xfc   : > { %1448 = vmatpush2.msra.mxu0 %v1317_v21  ;;  %1705 = vmatpush2.msra.mxu1 %v1381_v22 }
  0xfd   : > { %716 = vmatmul.mubr.f32.gmra.mxu0 %v337_v23  ;;  %973 = vmatmul.mubr.f32.gmra.mxu1 %v337_v23 }
  0xfe   : > { %721 = vmatprep.mubr.f32.mxu0 %v340_v24  ;;  %978 = vmatprep.mubr.f32.mxu1 %v340_v24 }
  0xff   : > { %1449 = vmatprep.subr.mxu0 %v1316_v25  ;;  %1706 = vmatprep.subr.mxu1 %v1380_v26 }
 0x100   : > { %1450 = vmatpush2.msra.mxu0 %v1315_v27  ;;  %1707 = vmatpush2.msra.mxu1 %v1379_v28 }
 0x101   : > { %722 = vmatmul.mubr.f32.gmra.mxu0 %v339_v29  ;;  %979 = vmatmul.mubr.f32.gmra.mxu1 %v339_v29 }
 0x102   : > { %727 = vmatprep.mubr.f32.mxu0 %v342_v30  ;;  %984 = vmatprep.mubr.f32.mxu1 %v342_v30 }
 0x103   : > { %1451 = vmatprep.subr.mxu0 %v1314_v31  ;;  %1708 = vmatprep.subr.mxu1 %v1378_v32 }
 0x104   : > { %1452 = vmatpush2.msra.mxu0 %v1313_v33  ;;  %1709 = vmatpush2.msra.mxu1 %v1377_v34 }
 0x105   : > { %728 = vmatmul.mubr.f32.gmra.mxu0 %v341_v35  ;;  %985 = vmatmul.mubr.f32.gmra.mxu1 %v341_v35 }
 0x106   : > { %733 = vmatprep.mubr.f32.mxu0 %v344_v36  ;;  %990 = vmatprep.mubr.f32.mxu1 %v344_v36 }
 0x107   : > { %1453 = vmatprep.subr.mxu0 %v1312_v37  ;;  %1710 = vmatprep.subr.mxu1 %v1376_v38 }
 0x108   : > { %1454 = vmatpush2.msra.mxu0 %v1311_v39  ;;  %1711 = vmatpush2.msra.mxu1 %v1375_v40 }
 0x109   : > { %734 = vmatmul.mubr.f32.gmra.mxu0 %v343_v41  ;;  %991 = vmatmul.mubr.f32.gmra.mxu1 %v343_v41 }
 0x10a   : > { %739 = vmatprep.mubr.f32.mxu0 %v346_v42  ;;  %996 = vmatprep.mubr.f32.mxu1 %v346_v42 }
 0x10b   : > { %1455 = vmatprep.subr.mxu0 %v1310_v43  ;;  %1712 = vmatprep.subr.mxu1 %v1374_v44 }
 0x10c   : > { %1456 = vmatpush2.msra.mxu0 %v1309_v45  ;;  %1713 = vmatpush2.msra.mxu1 %v1373_v46 }
 0x10d   : > { %740 = vmatmul.mubr.f32.gmra.mxu0 %v345_v47  ;;  %997 = vmatmul.mubr.f32.gmra.mxu1 %v345_v47 }
 0x10e   : > { %745 = vmatprep.mubr.f32.mxu0 %v348_v48  ;;  %1002 = vmatprep.mubr.f32.mxu1 %v348_v48 }
 0x10f   : > { %1457 = vmatprep.subr.mxu0 %v1308_v49  ;;  %1714 = vmatprep.subr.mxu1 %v1372_v50 }
 0x110   : > { %1458 = vmatpush2.msra.mxu0 %v1307_v51  ;;  %1715 = vmatpush2.msra.mxu1 %v1371_v52 }
 0x111   : > { %746 = vmatmul.mubr.f32.gmra.mxu0 %v347_v53  ;;  %1003 = vmatmul.mubr.f32.gmra.mxu1 %v347_v53 }
 0x112   : > { %751 = vmatprep.mubr.f32.mxu0 %v350_v54  ;;  %1008 = vmatprep.mubr.f32.mxu1 %v350_v54 }
 0x113   : > { %1459 = vmatprep.subr.mxu0 %v1306_v55  ;;  %1716 = vmatprep.subr.mxu1 %v1370_v56 }
 0x114   : > { %1460 = vmatpush2.msra.mxu0 %v1305_v57  ;;  %1717 = vmatpush2.msra.mxu1 %v1369_v58 }
 0x115   : > { %752 = vmatmul.mubr.f32.gmra.mxu0 %v349_v59  ;;  %1009 = vmatmul.mubr.f32.gmra.mxu1 %v349_v59 }
 0x116   : > { %1461 = vmatprep.subr.mxu0 %v1304_v60  ;;  %1718 = vmatprep.subr.mxu1 %v1368_v61 }
 0x117   : > { %1462 = vmatpush2.msra.mxu0 %v1303_v62  ;;  %1719 = vmatpush2.msra.mxu1 %v1367_v63 }
 0x159   : > { %v567_v11 = vpop.f32.mrf.mxu0  ;;  %v824_v12 = vpop.f32.mrf.mxu1 }
 0x15a   : > { %v568_v13 = vadd.f32 %v567_v11, %v2688_v7  ;;  %v825_v14 = vadd.f32 %v824_v12, %v2690_v8 }
 0x15b   : > { %v569_v15 = vpop.f32.mrf.mxu0  ;;  %v826_v16 = vpop.f32.mrf.mxu1 }
 0x15c   : > { %v1015_v17 = vmax.f32 %v568_v13, 0.0  ;;  %v1017_v18 = vmax.f32 %v825_v14, 0.0  ;;  %v570_v19 = vadd.f32 %v569_v15, %v2693_v9  ;;  %v827_v20 = vadd.f32 %v826_v16, %v2695_v10 }
 0x15d   : > { %v573_v21 = vpop.f32.mrf.mxu0  ;;  %v830_v22 = vpop.f32.mrf.mxu1 }
 0x15e   : > { %1143 = vst [vmem:[%s2701_s10] sm:$0xff] %v1015_v17  ;;  %1145 = vst [vmem:[%s2701_s10 + $0x10] sm:$0xff] %v1017_v18  ;;  %v1016_v23 = vmax.f32 %v570_v19, 0.0  ;;  %v1018_v24 = vmax.f32 %v827_v20, 0.0  ;;  %v574_v25 = vadd.f32 %v573_v21, %v2688_v7  ;;  %v831_v26 = vadd.f32 %v830_v22, %v2690_v8 }
 0x15f   : > { %v575_v27 = vpop.f32.mrf.mxu0  ;;  %v832_v28 = vpop.f32.mrf.mxu1 }
 0x160   : > { %1144 = vst [vmem:[%s2701_s10 + $0x8] sm:$0xff] %v1016_v23  ;;  %1146 = vst [vmem:[%s2701_s10 + $0x18] sm:$0xff] %v1018_v24  ;;  %v1019_v29 = vmax.f32 %v574_v25, 0.0  ;;  %v1021_v30 = vmax.f32 %v831_v26, 0.0  ;;  %v576_v31 = vadd.f32 %v575_v27, %v2693_v9  ;;  %v833_v32 = vadd.f32 %v832_v28, %v2695_v10  ;;  %1463 = vmatprep.mubr.f32.mxu0 %v1016_v23 }
 0x161   : > { %1720 = vmatprep.mubr.f32.mxu1 %v1018_v24  ;;  %v579_v33 = vpop.f32.mrf.mxu0  ;;  %v836_v34 = vpop.f32.mrf.mxu1  ;;  %1464 = vmatmul.mubr.f32.vlgmr.msra.gmra.mxu0 %v1015_v17 }
 0x162   : > { %1721 = vmatmul.mubr.f32.vlgmr.msra.gmra.mxu1 %v1017_v18  ;;  %1147 = vst [vmem:[%s2701_s10 + $0x20] sm:$0xff] %v1019_v29  ;;  %1149 = vst [vmem:[%s2701_s10 + $0x30] sm:$0xff] %v1021_v30  ;;  %v1020_v35 = vmax.f32 %v576_v31, 0.0  ;;  %v1022_v36 = vmax.f32 %v833_v32, 0.0  ;;  %v580_v37 = vadd.f32 %v579_v33, %v2688_v7  ;;  %v837_v38 = vadd.f32 %v836_v34, %v2690_v8 }
 0x163   : > { %v581_v39 = vpop.f32.mrf.mxu0  ;;  %v838_v40 = vpop.f32.mrf.mxu1 }
 0x164   : > { %1148 = vst [vmem:[%s2701_s10 + $0x28] sm:$0xff] %v1020_v35  ;;  %1150 = vst [vmem:[%s2701_s10 + $0x38] sm:$0xff] %v1022_v36  ;;  %v1023_v41 = vmax.f32 %v580_v37, 0.0  ;;  %v1025_v42 = vmax.f32 %v837_v38, 0.0  ;;  %v582_v43 = vadd.f32 %v581_v39, %v2693_v9  ;;  %v839_v44 = vadd.f32 %v838_v40, %v2695_v10  ;;  %1469 = vmatprep.mubr.f32.mxu0 %v1020_v35 }
 0x165   : > { %1726 = vmatprep.mubr.f32.mxu1 %v1022_v36  ;;  %v585_v45 = vpop.f32.mrf.mxu0  ;;  %v842_v46 = vpop.f32.mrf.mxu1  ;;  %1470 = vmatmul.mubr.f32.gmra.mxu0 %v1019_v29 }
 0x166   : > { %1727 = vmatmul.mubr.f32.gmra.mxu1 %v1021_v30  ;;  %1151 = vst [vmem:[%s2701_s10 + $0x40] sm:$0xff] %v1023_v41  ;;  %1153 = vst [vmem:[%s2701_s10 + $0x50] sm:$0xff] %v1025_v42  ;;  %v1024_v47 = vmax.f32 %v582_v43, 0.0  ;;  %v1026_v48 = vmax.f32 %v839_v44, 0.0  ;;  %v586_v49 = vadd.f32 %v585_v45, %v2688_v7  ;;  %v843_v50 = vadd.f32 %v842_v46, %v2690_v8 }
 0x167   : > { %v587_v51 = vpop.f32.mrf.mxu0  ;;  %v844_v52 = vpop.f32.mrf.mxu1 }
 0x168   : > { %1152 = vst [vmem:[%s2701_s10 + $0x48] sm:$0xff] %v1024_v47  ;;  %1154 = vst [vmem:[%s2701_s10 + $0x58] sm:$0xff] %v1026_v48  ;;  %v1027_v53 = vmax.f32 %v586_v49, 0.0  ;;  %v1029_v54 = vmax.f32 %v843_v50, 0.0  ;;  %v588_v55 = vadd.f32 %v587_v51, %v2693_v9  ;;  %v845_v56 = vadd.f32 %v844_v52, %v2695_v10  ;;  %1475 = vmatprep.mubr.f32.mxu0 %v1024_v47 }
 0x169   : > { %1732 = vmatprep.mubr.f32.mxu1 %v1026_v48  ;;  %v591_v57 = vpop.f32.mrf.mxu0  ;;  %v848_v58 = vpop.f32.mrf.mxu1  ;;  %1476 = vmatmul.mubr.f32.gmra.mxu0 %v1023_v41 }
 0x16a   : > { %1733 = vmatmul.mubr.f32.gmra.mxu1 %v1025_v42  ;;  %1155 = vst [vmem:[%s2701_s10 + $0x60] sm:$0xff] %v1027_v53  ;;  %1157 = vst [vmem:[%s2701_s10 + $0x70] sm:$0xff] %v1029_v54  ;;  %v1028_v59 = vmax.f32 %v588_v55, 0.0  ;;  %v1030_v60 = vmax.f32 %v845_v56, 0.0  ;;  %v592_v61 = vadd.f32 %v591_v57, %v2688_v7  ;;  %v849_v62 = vadd.f32 %v848_v58, %v2690_v8 }
 0x16b   : > { %v593_v63 = vpop.f32.mrf.mxu0  ;;  %v850_v0 = vpop.f32.mrf.mxu1 }
 0x16c   : > { %1156 = vst [vmem:[%s2701_s10 + $0x68] sm:$0xff] %v1028_v59  ;;  %1158 = vst [vmem:[%s2701_s10 + $0x78] sm:$0xff] %v1030_v60  ;;  %v1031_v1 = vmax.f32 %v592_v61, 0.0  ;;  %v1033_v2 = vmax.f32 %v849_v62, 0.0  ;;  %v594_v3 = vadd.f32 %v593_v63, %v2693_v9  ;;  %v851_v4 = vadd.f32 %v850_v0, %v2695_v10  ;;  %1481 = vmatprep.mubr.f32.mxu0 %v1028_v59 }
 0x16d   : > { %1738 = vmatprep.mubr.f32.mxu1 %v1030_v60  ;;  %v597_v5 = vpop.f32.mrf.mxu0  ;;  %v854_v6 = vpop.f32.mrf.mxu1  ;;  %1482 = vmatmul.mubr.f32.gmra.mxu0 %v1027_v53 }
 0x16e   : > { %1739 = vmatmul.mubr.f32.gmra.mxu1 %v1029_v54  ;;  %1159 = vst [vmem:[%s2701_s10 + $0x80] sm:$0xff] %v1031_v1  ;;  %1161 = vst [vmem:[%s2701_s10 + $0x90] sm:$0xff] %v1033_v2  ;;  %v1032_v11 = vmax.f32 %v594_v3, 0.0  ;;  %v1034_v12 = vmax.f32 %v851_v4, 0.0  ;;  %v598_v13 = vadd.f32 %v597_v5, %v2688_v7  ;;  %v855_v14 = vadd.f32 %v854_v6, %v2690_v8 }
 0x16f   : > { %v599_v15 = vpop.f32.mrf.mxu0  ;;  %v856_v16 = vpop.f32.mrf.mxu1 }
 0x170   : > { %1160 = vst [vmem:[%s2701_s10 + $0x88] sm:$0xff] %v1032_v11  ;;  %1162 = vst [vmem:[%s2701_s10 + $0x98] sm:$0xff] %v1034_v12  ;;  %v1035_v17 = vmax.f32 %v598_v13, 0.0  ;;  %v1037_v18 = vmax.f32 %v855_v14, 0.0  ;;  %v600_v19 = vadd.f32 %v599_v15, %v2693_v9  ;;  %v857_v20 = vadd.f32 %v856_v16, %v2695_v10  ;;  %1487 = vmatprep.mubr.f32.mxu0 %v1032_v11 }
 0x171   : > { %1744 = vmatprep.mubr.f32.mxu1 %v1034_v12  ;;  %v603_v21 = vpop.f32.mrf.mxu0  ;;  %v860_v22 = vpop.f32.mrf.mxu1  ;;  %1488 = vmatmul.mubr.f32.gmra.mxu0 %v1031_v1 }
 0x172   : > { %1745 = vmatmul.mubr.f32.gmra.mxu1 %v1033_v2  ;;  %1163 = vst [vmem:[%s2701_s10 + $0xa0] sm:$0xff] %v1035_v17  ;;  %1165 = vst [vmem:[%s2701_s10 + $0xb0] sm:$0xff] %v1037_v18  ;;  %v1036_v23 = vmax.f32 %v600_v19, 0.0  ;;  %v1038_v24 = vmax.f32 %v857_v20, 0.0  ;;  %v604_v25 = vadd.f32 %v603_v21, %v2688_v7  ;;  %v861_v26 = vadd.f32 %v860_v22, %v2690_v8 }
 0x173   : > { %v605_v27 = vpop.f32.mrf.mxu0  ;;  %v862_v28 = vpop.f32.mrf.mxu1 }
 0x174   : > { %1164 = vst [vmem:[%s2701_s10 + $0xa8] sm:$0xff] %v1036_v23  ;;  %1166 = vst [vmem:[%s2701_s10 + $0xb8] sm:$0xff] %v1038_v24  ;;  %v1039_v29 = vmax.f32 %v604_v25, 0.0  ;;  %v1041_v30 = vmax.f32 %v861_v26, 0.0  ;;  %v606_v31 = vadd.f32 %v605_v27, %v2693_v9  ;;  %v863_v32 = vadd.f32 %v862_v28, %v2695_v10  ;;  %1493 = vmatprep.mubr.f32.mxu0 %v1036_v23 }
 0x175   : > { %1750 = vmatprep.mubr.f32.mxu1 %v1038_v24  ;;  %v609_v33 = vpop.f32.mrf.mxu0  ;;  %v866_v34 = vpop.f32.mrf.mxu1  ;;  %1494 = vmatmul.mubr.f32.gmra.mxu0 %v1035_v17 }
 0x176   : > { %1751 = vmatmul.mubr.f32.gmra.mxu1 %v1037_v18  ;;  %1167 = vst [vmem:[%s2701_s10 + $0xc0] sm:$0xff] %v1039_v29  ;;  %1169 = vst [vmem:[%s2701_s10 + $0xd0] sm:$0xff] %v1041_v30  ;;  %v1040_v35 = vmax.f32 %v606_v31, 0.0  ;;  %v1042_v36 = vmax.f32 %v863_v32, 0.0  ;;  %v610_v37 = vadd.f32 %v609_v33, %v2688_v7  ;;  %v867_v38 = vadd.f32 %v866_v34, %v2690_v8 }
 0x177   : > { %v611_v39 = vpop.f32.mrf.mxu0  ;;  %v868_v40 = vpop.f32.mrf.mxu1 }
 0x178   : > { %1168 = vst [vmem:[%s2701_s10 + $0xc8] sm:$0xff] %v1040_v35  ;;  %1170 = vst [vmem:[%s2701_s10 + $0xd8] sm:$0xff] %v1042_v36  ;;  %v1043_v41 = vmax.f32 %v610_v37, 0.0  ;;  %v1045_v42 = vmax.f32 %v867_v38, 0.0  ;;  %v612_v43 = vadd.f32 %v611_v39, %v2693_v9  ;;  %v869_v44 = vadd.f32 %v868_v40, %v2695_v10  ;;  %1499 = vmatprep.mubr.f32.mxu0 %v1040_v35 }
 0x179   : > { %1756 = vmatprep.mubr.f32.mxu1 %v1042_v36  ;;  %v615_v45 = vpop.f32.mrf.mxu0  ;;  %v872_v46 = vpop.f32.mrf.mxu1  ;;  %1500 = vmatmul.mubr.f32.gmra.mxu0 %v1039_v29 }
 0x17a   : > { %1757 = vmatmul.mubr.f32.gmra.mxu1 %v1041_v30  ;;  %1171 = vst [vmem:[%s2701_s10 + $0xe0] sm:$0xff] %v1043_v41  ;;  %1173 = vst [vmem:[%s2701_s10 + $0xf0] sm:$0xff] %v1045_v42  ;;  %v1044_v47 = vmax.f32 %v612_v43, 0.0  ;;  %v1046_v48 = vmax.f32 %v869_v44, 0.0  ;;  %v616_v49 = vadd.f32 %v615_v45, %v2688_v7  ;;  %v873_v50 = vadd.f32 %v872_v46, %v2690_v8 }
 0x17b   : > { %v617_v51 = vpop.f32.mrf.mxu0  ;;  %v874_v52 = vpop.f32.mrf.mxu1 }
 0x17c   : > { %1172 = vst [vmem:[%s2701_s10 + $0xe8] sm:$0xff] %v1044_v47  ;;  %1174 = vst [vmem:[%s2701_s10 + $0xf8] sm:$0xff] %v1046_v48  ;;  %v1047_v53 = vmax.f32 %v616_v49, 0.0  ;;  %v1049_v54 = vmax.f32 %v873_v50, 0.0  ;;  %v618_v55 = vadd.f32 %v617_v51, %v2693_v9  ;;  %v875_v56 = vadd.f32 %v874_v52, %v2695_v10  ;;  %1505 = vmatprep.mubr.f32.mxu0 %v1044_v47 }
 0x17d   : > { %1762 = vmatprep.mubr.f32.mxu1 %v1046_v48  ;;  %v621_v57 = vpop.f32.mrf.mxu0  ;;  %v878_v58 = vpop.f32.mrf.mxu1  ;;  %1506 = vmatmul.mubr.f32.gmra.mxu0 %v1043_v41 }
 0x17e   : > { %1763 = vmatmul.mubr.f32.gmra.mxu1 %v1045_v42  ;;  %1175 = vst [vmem:[%s2701_s10 + $0x100] sm:$0xff] %v1047_v53  ;;  %1177 = vst [vmem:[%s2701_s10 + $0x110] sm:$0xff] %v1049_v54  ;;  %v1048_v59 = vmax.f32 %v618_v55, 0.0  ;;  %v1050_v60 = vmax.f32 %v875_v56, 0.0  ;;  %v622_v61 = vadd.f32 %v621_v57, %v2688_v7  ;;  %v879_v62 = vadd.f32 %v878_v58, %v2690_v8 }
 0x17f   : > { %v623_v63 = vpop.f32.mrf.mxu0  ;;  %v880_v0 = vpop.f32.mrf.mxu1 }
 0x180   : > { %1176 = vst [vmem:[%s2701_s10 + $0x108] sm:$0xff] %v1048_v59  ;;  %1178 = vst [vmem:[%s2701_s10 + $0x118] sm:$0xff] %v1050_v60  ;;  %v1051_v1 = vmax.f32 %v622_v61, 0.0  ;;  %v1053_v2 = vmax.f32 %v879_v62, 0.0  ;;  %v624_v3 = vadd.f32 %v623_v63, %v2693_v9  ;;  %v881_v4 = vadd.f32 %v880_v0, %v2695_v10  ;;  %1511 = vmatprep.mubr.f32.mxu0 %v1048_v59 }
 0x181   : > { %1768 = vmatprep.mubr.f32.mxu1 %v1050_v60  ;;  %v627_v5 = vpop.f32.mrf.mxu0  ;;  %v884_v6 = vpop.f32.mrf.mxu1  ;;  %1512 = vmatmul.mubr.f32.gmra.mxu0 %v1047_v53 }
 0x182   : > { %1769 = vmatmul.mubr.f32.gmra.mxu1 %v1049_v54  ;;  %1179 = vst [vmem:[%s2701_s10 + $0x120] sm:$0xff] %v1051_v1  ;;  %1181 = vst [vmem:[%s2701_s10 + $0x130] sm:$0xff] %v1053_v2  ;;  %v1052_v11 = vmax.f32 %v624_v3, 0.0  ;;  %v1054_v12 = vmax.f32 %v881_v4, 0.0  ;;  %v628_v13 = vadd.f32 %v627_v5, %v2688_v7  ;;  %v885_v14 = vadd.f32 %v884_v6, %v2690_v8 }
 0x183   : > { %v629_v15 = vpop.f32.mrf.mxu0  ;;  %v886_v16 = vpop.f32.mrf.mxu1 }
 0x184   : > { %1180 = vst [vmem:[%s2701_s10 + $0x128] sm:$0xff] %v1052_v11  ;;  %1182 = vst [vmem:[%s2701_s10 + $0x138] sm:$0xff] %v1054_v12  ;;  %v1055_v17 = vmax.f32 %v628_v13, 0.0  ;;  %v1057_v18 = vmax.f32 %v885_v14, 0.0  ;;  %v630_v19 = vadd.f32 %v629_v15, %v2693_v9  ;;  %v887_v20 = vadd.f32 %v886_v16, %v2695_v10  ;;  %1517 = vmatprep.mubr.f32.mxu0 %v1052_v11 }
 0x185   : > { %1774 = vmatprep.mubr.f32.mxu1 %v1054_v12  ;;  %v633_v21 = vpop.f32.mrf.mxu0  ;;  %v890_v22 = vpop.f32.mrf.mxu1  ;;  %1518 = vmatmul.mubr.f32.gmra.mxu0 %v1051_v1 }
 0x186   : > { %1775 = vmatmul.mubr.f32.gmra.mxu1 %v1053_v2  ;;  %1183 = vst [vmem:[%s2701_s10 + $0x140] sm:$0xff] %v1055_v17  ;;  %1185 = vst [vmem:[%s2701_s10 + $0x150] sm:$0xff] %v1057_v18  ;;  %v1056_v23 = vmax.f32 %v630_v19, 0.0  ;;  %v1058_v24 = vmax.f32 %v887_v20, 0.0  ;;  %v634_v25 = vadd.f32 %v633_v21, %v2688_v7  ;;  %v891_v26 = vadd.f32 %v890_v22, %v2690_v8 }
 0x187   : > { %v635_v27 = vpop.f32.mrf.mxu0  ;;  %v892_v28 = vpop.f32.mrf.mxu1 }
 0x188   : > { %1184 = vst [vmem:[%s2701_s10 + $0x148] sm:$0xff] %v1056_v23  ;;  %1186 = vst [vmem:[%s2701_s10 + $0x158] sm:$0xff] %v1058_v24  ;;  %v1059_v29 = vmax.f32 %v634_v25, 0.0  ;;  %v1061_v30 = vmax.f32 %v891_v26, 0.0  ;;  %v636_v31 = vadd.f32 %v635_v27, %v2693_v9  ;;  %v893_v32 = vadd.f32 %v892_v28, %v2695_v10  ;;  %1523 = vmatprep.mubr.f32.mxu0 %v1056_v23 }
 0x189   : > { %1780 = vmatprep.mubr.f32.mxu1 %v1058_v24  ;;  %v639_v33 = vpop.f32.mrf.mxu0  ;;  %v896_v34 = vpop.f32.mrf.mxu1  ;;  %1524 = vmatmul.mubr.f32.gmra.mxu0 %v1055_v17 }
 0x18a   : > { %1781 = vmatmul.mubr.f32.gmra.mxu1 %v1057_v18  ;;  %1187 = vst [vmem:[%s2701_s10 + $0x160] sm:$0xff] %v1059_v29  ;;  %1189 = vst [vmem:[%s2701_s10 + $0x170] sm:$0xff] %v1061_v30  ;;  %v1060_v35 = vmax.f32 %v636_v31, 0.0  ;;  %v1062_v36 = vmax.f32 %v893_v32, 0.0  ;;  %v640_v37 = vadd.f32 %v639_v33, %v2688_v7  ;;  %v897_v38 = vadd.f32 %v896_v34, %v2690_v8 }
 0x18b   : > { %v641_v39 = vpop.f32.mrf.mxu0  ;;  %v898_v40 = vpop.f32.mrf.mxu1 }
 0x18c   : > { %1188 = vst [vmem:[%s2701_s10 + $0x168] sm:$0xff] %v1060_v35  ;;  %1190 = vst [vmem:[%s2701_s10 + $0x178] sm:$0xff] %v1062_v36  ;;  %v1063_v41 = vmax.f32 %v640_v37, 0.0  ;;  %v1065_v42 = vmax.f32 %v897_v38, 0.0  ;;  %v642_v43 = vadd.f32 %v641_v39, %v2693_v9  ;;  %v899_v44 = vadd.f32 %v898_v40, %v2695_v10  ;;  %1529 = vmatprep.mubr.f32.mxu0 %v1060_v35 }
 0x18d   : > { %1786 = vmatprep.mubr.f32.mxu1 %v1062_v36  ;;  %v645_v45 = vpop.f32.mrf.mxu0  ;;  %v902_v46 = vpop.f32.mrf.mxu1  ;;  %1530 = vmatmul.mubr.f32.gmra.mxu0 %v1059_v29 }
 0x18e   : > { %1787 = vmatmul.mubr.f32.gmra.mxu1 %v1061_v30  ;;  %1191 = vst [vmem:[%s2701_s10 + $0x180] sm:$0xff] %v1063_v41  ;;  %1193 = vst [vmem:[%s2701_s10 + $0x190] sm:$0xff] %v1065_v42  ;;  %v1064_v47 = vmax.f32 %v642_v43, 0.0  ;;  %v1066_v48 = vmax.f32 %v899_v44, 0.0  ;;  %v646_v49 = vadd.f32 %v645_v45, %v2688_v7  ;;  %v903_v50 = vadd.f32 %v902_v46, %v2690_v8 }
 0x18f   : > { %v647_v51 = vpop.f32.mrf.mxu0  ;;  %v904_v52 = vpop.f32.mrf.mxu1 }
 0x190   : > { %1192 = vst [vmem:[%s2701_s10 + $0x188] sm:$0xff] %v1064_v47  ;;  %1194 = vst [vmem:[%s2701_s10 + $0x198] sm:$0xff] %v1066_v48  ;;  %v1067_v53 = vmax.f32 %v646_v49, 0.0  ;;  %v1069_v54 = vmax.f32 %v903_v50, 0.0  ;;  %v648_v55 = vadd.f32 %v647_v51, %v2693_v9  ;;  %v905_v56 = vadd.f32 %v904_v52, %v2695_v10  ;;  %1535 = vmatprep.mubr.f32.mxu0 %v1064_v47 }
 0x191   : > { %1792 = vmatprep.mubr.f32.mxu1 %v1066_v48  ;;  %v651_v57 = vpop.f32.mrf.mxu0  ;;  %v908_v58 = vpop.f32.mrf.mxu1  ;;  %1536 = vmatmul.mubr.f32.gmra.mxu0 %v1063_v41 }
 0x192   : > { %1793 = vmatmul.mubr.f32.gmra.mxu1 %v1065_v42  ;;  %1195 = vst [vmem:[%s2701_s10 + $0x1a0] sm:$0xff] %v1067_v53  ;;  %1197 = vst [vmem:[%s2701_s10 + $0x1b0] sm:$0xff] %v1069_v54  ;;  %v1068_v59 = vmax.f32 %v648_v55, 0.0  ;;  %v1070_v60 = vmax.f32 %v905_v56, 0.0  ;;  %v652_v61 = vadd.f32 %v651_v57, %v2688_v7  ;;  %v909_v62 = vadd.f32 %v908_v58, %v2690_v8 }
 0x193   : > { %v653_v63 = vpop.f32.mrf.mxu0  ;;  %v910_v0 = vpop.f32.mrf.mxu1 }
 0x194   : > { %1196 = vst [vmem:[%s2701_s10 + $0x1a8] sm:$0xff] %v1068_v59  ;;  %1198 = vst [vmem:[%s2701_s10 + $0x1b8] sm:$0xff] %v1070_v60  ;;  %v1071_v1 = vmax.f32 %v652_v61, 0.0  ;;  %v1073_v2 = vmax.f32 %v909_v62, 0.0  ;;  %v654_v3 = vadd.f32 %v653_v63, %v2693_v9  ;;  %v911_v4 = vadd.f32 %v910_v0, %v2695_v10  ;;  %1541 = vmatprep.mubr.f32.mxu0 %v1068_v59 }
 0x195   : > { %1798 = vmatprep.mubr.f32.mxu1 %v1070_v60  ;;  %v657_v5 = vpop.f32.mrf.mxu0  ;;  %v914_v6 = vpop.f32.mrf.mxu1  ;;  %1542 = vmatmul.mubr.f32.gmra.mxu0 %v1067_v53 }
 0x196   : > { %1799 = vmatmul.mubr.f32.gmra.mxu1 %v1069_v54  ;;  %1199 = vst [vmem:[%s2701_s10 + $0x1c0] sm:$0xff] %v1071_v1  ;;  %1201 = vst [vmem:[%s2701_s10 + $0x1d0] sm:$0xff] %v1073_v2  ;;  %v1072_v11 = vmax.f32 %v654_v3, 0.0  ;;  %v1074_v12 = vmax.f32 %v911_v4, 0.0  ;;  %v658_v13 = vadd.f32 %v657_v5, %v2688_v7  ;;  %v915_v14 = vadd.f32 %v914_v6, %v2690_v8 }
 0x197   : > { %v659_v15 = vpop.f32.mrf.mxu0  ;;  %v916_v16 = vpop.f32.mrf.mxu1 }
 0x198   : > { %1200 = vst [vmem:[%s2701_s10 + $0x1c8] sm:$0xff] %v1072_v11  ;;  %1202 = vst [vmem:[%s2701_s10 + $0x1d8] sm:$0xff] %v1074_v12  ;;  %v1075_v17 = vmax.f32 %v658_v13, 0.0  ;;  %v1077_v18 = vmax.f32 %v915_v14, 0.0  ;;  %v660_v19 = vadd.f32 %v659_v15, %v2693_v9  ;;  %v917_v20 = vadd.f32 %v916_v16, %v2695_v10  ;;  %1547 = vmatprep.mubr.f32.mxu0 %v1072_v11 }
 0x199   : > { %1804 = vmatprep.mubr.f32.mxu1 %v1074_v12  ;;  %v663_v21 = vpop.f32.mrf.mxu0  ;;  %v920_v22 = vpop.f32.mrf.mxu1  ;;  %1548 = vmatmul.mubr.f32.gmra.mxu0 %v1071_v1 }
 0x19a   : > { %1805 = vmatmul.mubr.f32.gmra.mxu1 %v1073_v2  ;;  %1203 = vst [vmem:[%s2701_s10 + $0x1e0] sm:$0xff] %v1075_v17  ;;  %1205 = vst [vmem:[%s2701_s10 + $0x1f0] sm:$0xff] %v1077_v18  ;;  %v1076_v23 = vmax.f32 %v660_v19, 0.0  ;;  %v1078_v24 = vmax.f32 %v917_v20, 0.0  ;;  %v664_v25 = vadd.f32 %v663_v21, %v2688_v7  ;;  %v921_v26 = vadd.f32 %v920_v22, %v2690_v8 }
 0x19b   : > { %v665_v27 = vpop.f32.mrf.mxu0  ;;  %v922_v28 = vpop.f32.mrf.mxu1 }
 0x19c   : > { %1204 = vst [vmem:[%s2701_s10 + $0x1e8] sm:$0xff] %v1076_v23  ;;  %1206 = vst [vmem:[%s2701_s10 + $0x1f8] sm:$0xff] %v1078_v24  ;;  %v1079_v29 = vmax.f32 %v664_v25, 0.0  ;;  %v1081_v30 = vmax.f32 %v921_v26, 0.0  ;;  %v666_v31 = vadd.f32 %v665_v27, %v2693_v9  ;;  %v923_v32 = vadd.f32 %v922_v28, %v2695_v10  ;;  %1553 = vmatprep.mubr.f32.mxu0 %v1076_v23 }
 0x19d   : > { %1810 = vmatprep.mubr.f32.mxu1 %v1078_v24  ;;  %v669_v33 = vpop.f32.mrf.mxu0  ;;  %v926_v34 = vpop.f32.mrf.mxu1  ;;  %1554 = vmatmul.mubr.f32.gmra.mxu0 %v1075_v17 }
 0x19e   : > { %1811 = vmatmul.mubr.f32.gmra.mxu1 %v1077_v18  ;;  %1207 = vst [vmem:[%s2701_s10 + $0x200] sm:$0xff] %v1079_v29  ;;  %1209 = vst [vmem:[%s2701_s10 + $0x210] sm:$0xff] %v1081_v30  ;;  %v1080_v35 = vmax.f32 %v666_v31, 0.0  ;;  %v1082_v36 = vmax.f32 %v923_v32, 0.0  ;;  %v670_v37 = vadd.f32 %v669_v33, %v2688_v7  ;;  %v927_v38 = vadd.f32 %v926_v34, %v2690_v8 }
 0x19f   : > { %v671_v39 = vpop.f32.mrf.mxu0  ;;  %v928_v40 = vpop.f32.mrf.mxu1 }
 0x1a0   : > { %1208 = vst [vmem:[%s2701_s10 + $0x208] sm:$0xff] %v1080_v35  ;;  %1210 = vst [vmem:[%s2701_s10 + $0x218] sm:$0xff] %v1082_v36  ;;  %v1083_v41 = vmax.f32 %v670_v37, 0.0  ;;  %v1085_v42 = vmax.f32 %v927_v38, 0.0  ;;  %v672_v43 = vadd.f32 %v671_v39, %v2693_v9  ;;  %v929_v44 = vadd.f32 %v928_v40, %v2695_v10  ;;  %1559 = vmatprep.mubr.f32.mxu0 %v1080_v35 }
 0x1a1   : > { %1816 = vmatprep.mubr.f32.mxu1 %v1082_v36  ;;  %v675_v45 = vpop.f32.mrf.mxu0  ;;  %v932_v46 = vpop.f32.mrf.mxu1  ;;  %1560 = vmatmul.mubr.f32.gmra.mxu0 %v1079_v29 }
 0x1a2   : > { %1817 = vmatmul.mubr.f32.gmra.mxu1 %v1081_v30  ;;  %1211 = vst [vmem:[%s2701_s10 + $0x220] sm:$0xff] %v1083_v41  ;;  %1213 = vst [vmem:[%s2701_s10 + $0x230] sm:$0xff] %v1085_v42  ;;  %v1084_v47 = vmax.f32 %v672_v43, 0.0  ;;  %v1086_v48 = vmax.f32 %v929_v44, 0.0  ;;  %v676_v49 = vadd.f32 %v675_v45, %v2688_v7  ;;  %v933_v50 = vadd.f32 %v932_v46, %v2690_v8 }
 0x1a3   : > { %v677_v51 = vpop.f32.mrf.mxu0  ;;  %v934_v52 = vpop.f32.mrf.mxu1 }
 0x1a4   : > { %1212 = vst [vmem:[%s2701_s10 + $0x228] sm:$0xff] %v1084_v47  ;;  %1214 = vst [vmem:[%s2701_s10 + $0x238] sm:$0xff] %v1086_v48  ;;  %v1087_v53 = vmax.f32 %v676_v49, 0.0  ;;  %v1089_v54 = vmax.f32 %v933_v50, 0.0  ;;  %v678_v55 = vadd.f32 %v677_v51, %v2693_v9  ;;  %v935_v56 = vadd.f32 %v934_v52, %v2695_v10  ;;  %1565 = vmatprep.mubr.f32.mxu0 %v1084_v47 }
 0x1a5   : > { %1822 = vmatprep.mubr.f32.mxu1 %v1086_v48  ;;  %v681_v57 = vpop.f32.mrf.mxu0  ;;  %v938_v58 = vpop.f32.mrf.mxu1  ;;  %1566 = vmatmul.mubr.f32.gmra.mxu0 %v1083_v41 }
 0x1a6   : > { %1823 = vmatmul.mubr.f32.gmra.mxu1 %v1085_v42  ;;  %1215 = vst [vmem:[%s2701_s10 + $0x240] sm:$0xff] %v1087_v53  ;;  %1217 = vst [vmem:[%s2701_s10 + $0x250] sm:$0xff] %v1089_v54  ;;  %v1088_v59 = vmax.f32 %v678_v55, 0.0  ;;  %v1090_v60 = vmax.f32 %v935_v56, 0.0  ;;  %v682_v61 = vadd.f32 %v681_v57, %v2688_v7  ;;  %v939_v62 = vadd.f32 %v938_v58, %v2690_v8 }
 0x1a7   : > { %v683_v63 = vpop.f32.mrf.mxu0  ;;  %v940_v0 = vpop.f32.mrf.mxu1 }
 0x1a8   : > { %1216 = vst [vmem:[%s2701_s10 + $0x248] sm:$0xff] %v1088_v59  ;;  %1218 = vst [vmem:[%s2701_s10 + $0x258] sm:$0xff] %v1090_v60  ;;  %v1091_v1 = vmax.f32 %v682_v61, 0.0  ;;  %v1093_v2 = vmax.f32 %v939_v62, 0.0  ;;  %v684_v3 = vadd.f32 %v683_v63, %v2693_v9  ;;  %v941_v4 = vadd.f32 %v940_v0, %v2695_v10  ;;  %1571 = vmatprep.mubr.f32.mxu0 %v1088_v59 }
 0x1a9   : > { %1828 = vmatprep.mubr.f32.mxu1 %v1090_v60  ;;  %v687_v5 = vpop.f32.mrf.mxu0  ;;  %v944_v6 = vpop.f32.mrf.mxu1  ;;  %1572 = vmatmul.mubr.f32.gmra.mxu0 %v1087_v53 }
 0x1aa   : > { %1829 = vmatmul.mubr.f32.gmra.mxu1 %v1089_v54  ;;  %1219 = vst [vmem:[%s2701_s10 + $0x260] sm:$0xff] %v1091_v1  ;;  %1221 = vst [vmem:[%s2701_s10 + $0x270] sm:$0xff] %v1093_v2  ;;  %v1092_v11 = vmax.f32 %v684_v3, 0.0  ;;  %v1094_v12 = vmax.f32 %v941_v4, 0.0  ;;  %v688_v13 = vadd.f32 %v687_v5, %v2688_v7  ;;  %v945_v14 = vadd.f32 %v944_v6, %v2690_v8 }
 0x1ab   : > { %v689_v15 = vpop.f32.mrf.mxu0  ;;  %v946_v16 = vpop.f32.mrf.mxu1 }
 0x1ac   : > { %1220 = vst [vmem:[%s2701_s10 + $0x268] sm:$0xff] %v1092_v11  ;;  %1222 = vst [vmem:[%s2701_s10 + $0x278] sm:$0xff] %v1094_v12  ;;  %v1095_v17 = vmax.f32 %v688_v13, 0.0  ;;  %v1097_v18 = vmax.f32 %v945_v14, 0.0  ;;  %v690_v19 = vadd.f32 %v689_v15, %v2693_v9  ;;  %v947_v20 = vadd.f32 %v946_v16, %v2695_v10  ;;  %1577 = vmatprep.mubr.f32.mxu0 %v1092_v11 }
 0x1ad   : > { %1834 = vmatprep.mubr.f32.mxu1 %v1094_v12  ;;  %v693_v21 = vpop.f32.mrf.mxu0  ;;  %v950_v22 = vpop.f32.mrf.mxu1  ;;  %1578 = vmatmul.mubr.f32.gmra.mxu0 %v1091_v1 }
 0x1ae   : > { %1835 = vmatmul.mubr.f32.gmra.mxu1 %v1093_v2  ;;  %1223 = vst [vmem:[%s2701_s10 + $0x280] sm:$0xff] %v1095_v17  ;;  %1225 = vst [vmem:[%s2701_s10 + $0x290] sm:$0xff] %v1097_v18  ;;  %v1096_v23 = vmax.f32 %v690_v19, 0.0  ;;  %v1098_v24 = vmax.f32 %v947_v20, 0.0  ;;  %v694_v25 = vadd.f32 %v693_v21, %v2688_v7  ;;  %v951_v26 = vadd.f32 %v950_v22, %v2690_v8 }
 0x1af   : > { %v695_v27 = vpop.f32.mrf.mxu0  ;;  %v952_v28 = vpop.f32.mrf.mxu1 }
 0x1b0   : > { %1224 = vst [vmem:[%s2701_s10 + $0x288] sm:$0xff] %v1096_v23  ;;  %1226 = vst [vmem:[%s2701_s10 + $0x298] sm:$0xff] %v1098_v24  ;;  %v1099_v29 = vmax.f32 %v694_v25, 0.0  ;;  %v1101_v30 = vmax.f32 %v951_v26, 0.0  ;;  %v696_v31 = vadd.f32 %v695_v27, %v2693_v9  ;;  %v953_v32 = vadd.f32 %v952_v28, %v2695_v10  ;;  %1583 = vmatprep.mubr.f32.mxu0 %v1096_v23 }
 0x1b1   : > { %1840 = vmatprep.mubr.f32.mxu1 %v1098_v24  ;;  %v699_v33 = vpop.f32.mrf.mxu0  ;;  %v956_v34 = vpop.f32.mrf.mxu1  ;;  %1584 = vmatmul.mubr.f32.gmra.mxu0 %v1095_v17 }
 0x1b2   : > { %1841 = vmatmul.mubr.f32.gmra.mxu1 %v1097_v18  ;;  %1227 = vst [vmem:[%s2701_s10 + $0x2a0] sm:$0xff] %v1099_v29  ;;  %1229 = vst [vmem:[%s2701_s10 + $0x2b0] sm:$0xff] %v1101_v30  ;;  %v1100_v35 = vmax.f32 %v696_v31, 0.0  ;;  %v1102_v36 = vmax.f32 %v953_v32, 0.0  ;;  %v700_v37 = vadd.f32 %v699_v33, %v2688_v7  ;;  %v957_v38 = vadd.f32 %v956_v34, %v2690_v8 }
 0x1b3   : > { %v701_v39 = vpop.f32.mrf.mxu0  ;;  %v958_v40 = vpop.f32.mrf.mxu1 }
 0x1b4   : > { %1228 = vst [vmem:[%s2701_s10 + $0x2a8] sm:$0xff] %v1100_v35  ;;  %1230 = vst [vmem:[%s2701_s10 + $0x2b8] sm:$0xff] %v1102_v36  ;;  %v1103_v41 = vmax.f32 %v700_v37, 0.0  ;;  %v1105_v42 = vmax.f32 %v957_v38, 0.0  ;;  %v702_v43 = vadd.f32 %v701_v39, %v2693_v9  ;;  %v959_v44 = vadd.f32 %v958_v40, %v2695_v10  ;;  %1589 = vmatprep.mubr.f32.mxu0 %v1100_v35 }
 0x1b5   : > { %1846 = vmatprep.mubr.f32.mxu1 %v1102_v36  ;;  %v705_v45 = vpop.f32.mrf.mxu0  ;;  %v962_v46 = vpop.f32.mrf.mxu1  ;;  %1590 = vmatmul.mubr.f32.gmra.mxu0 %v1099_v29 }
 0x1b6   : > { %1847 = vmatmul.mubr.f32.gmra.mxu1 %v1101_v30  ;;  %1231 = vst [vmem:[%s2701_s10 + $0x2c0] sm:$0xff] %v1103_v41  ;;  %1233 = vst [vmem:[%s2701_s10 + $0x2d0] sm:$0xff] %v1105_v42  ;;  %v1104_v47 = vmax.f32 %v702_v43, 0.0  ;;  %v1106_v48 = vmax.f32 %v959_v44, 0.0  ;;  %v706_v49 = vadd.f32 %v705_v45, %v2688_v7  ;;  %v963_v50 = vadd.f32 %v962_v46, %v2690_v8 }
 0x1b7   : > { %v707_v51 = vpop.f32.mrf.mxu0  ;;  %v964_v52 = vpop.f32.mrf.mxu1 }
 0x1b8   : > { %1232 = vst [vmem:[%s2701_s10 + $0x2c8] sm:$0xff] %v1104_v47  ;;  %1234 = vst [vmem:[%s2701_s10 + $0x2d8] sm:$0xff] %v1106_v48  ;;  %v1107_v53 = vmax.f32 %v706_v49, 0.0  ;;  %v1109_v54 = vmax.f32 %v963_v50, 0.0  ;;  %v708_v55 = vadd.f32 %v707_v51, %v2693_v9  ;;  %v965_v56 = vadd.f32 %v964_v52, %v2695_v10  ;;  %1595 = vmatprep.mubr.f32.mxu0 %v1104_v47 }
 0x1b9   : > { %1852 = vmatprep.mubr.f32.mxu1 %v1106_v48  ;;  %v711_v57 = vpop.f32.mrf.mxu0  ;;  %v968_v58 = vpop.f32.mrf.mxu1  ;;  %1596 = vmatmul.mubr.f32.gmra.mxu0 %v1103_v41 }
 0x1ba   : > { %1853 = vmatmul.mubr.f32.gmra.mxu1 %v1105_v42  ;;  %1235 = vst [vmem:[%s2701_s10 + $0x2e0] sm:$0xff] %v1107_v53  ;;  %1237 = vst [vmem:[%s2701_s10 + $0x2f0] sm:$0xff] %v1109_v54  ;;  %v1108_v59 = vmax.f32 %v708_v55, 0.0  ;;  %v1110_v60 = vmax.f32 %v965_v56, 0.0  ;;  %v712_v61 = vadd.f32 %v711_v57, %v2688_v7  ;;  %v969_v62 = vadd.f32 %v968_v58, %v2690_v8 }
 0x1bb   : > { %v713_v63 = vpop.f32.mrf.mxu0  ;;  %v970_v0 = vpop.f32.mrf.mxu1 }
 0x1bc   : > { %1236 = vst [vmem:[%s2701_s10 + $0x2e8] sm:$0xff] %v1108_v59  ;;  %1238 = vst [vmem:[%s2701_s10 + $0x2f8] sm:$0xff] %v1110_v60  ;;  %v1111_v1 = vmax.f32 %v712_v61, 0.0  ;;  %v1113_v2 = vmax.f32 %v969_v62, 0.0  ;;  %v714_v3 = vadd.f32 %v713_v63, %v2693_v9  ;;  %v971_v4 = vadd.f32 %v970_v0, %v2695_v10  ;;  %1601 = vmatprep.mubr.f32.mxu0 %v1108_v59 }
 0x1bd   : > { %1858 = vmatprep.mubr.f32.mxu1 %v1110_v60  ;;  %v717_v5 = vpop.f32.mrf.mxu0  ;;  %v974_v6 = vpop.f32.mrf.mxu1  ;;  %1602 = vmatmul.mubr.f32.gmra.mxu0 %v1107_v53 }
 0x1be   : > { %1859 = vmatmul.mubr.f32.gmra.mxu1 %v1109_v54  ;;  %1239 = vst [vmem:[%s2701_s10 + $0x300] sm:$0xff] %v1111_v1  ;;  %1241 = vst [vmem:[%s2701_s10 + $0x310] sm:$0xff] %v1113_v2  ;;  %v1112_v11 = vmax.f32 %v714_v3, 0.0  ;;  %v1114_v12 = vmax.f32 %v971_v4, 0.0  ;;  %v718_v13 = vadd.f32 %v717_v5, %v2688_v7  ;;  %v975_v14 = vadd.f32 %v974_v6, %v2690_v8 }
 0x1bf   : > { %v719_v15 = vpop.f32.mrf.mxu0  ;;  %v976_v16 = vpop.f32.mrf.mxu1 }
 0x1c0   : > { %1240 = vst [vmem:[%s2701_s10 + $0x308] sm:$0xff] %v1112_v11  ;;  %1242 = vst [vmem:[%s2701_s10 + $0x318] sm:$0xff] %v1114_v12  ;;  %v1115_v17 = vmax.f32 %v718_v13, 0.0  ;;  %v1117_v18 = vmax.f32 %v975_v14, 0.0  ;;  %v720_v19 = vadd.f32 %v719_v15, %v2693_v9  ;;  %v977_v20 = vadd.f32 %v976_v16, %v2695_v10  ;;  %1607 = vmatprep.mubr.f32.mxu0 %v1112_v11 }
 0x1c1   : > { %1864 = vmatprep.mubr.f32.mxu1 %v1114_v12  ;;  %v723_v21 = vpop.f32.mrf.mxu0  ;;  %v980_v22 = vpop.f32.mrf.mxu1  ;;  %1608 = vmatmul.mubr.f32.gmra.mxu0 %v1111_v1 }
 0x1c2   : > { %1865 = vmatmul.mubr.f32.gmra.mxu1 %v1113_v2  ;;  %1243 = vst [vmem:[%s2701_s10 + $0x320] sm:$0xff] %v1115_v17  ;;  %1245 = vst [vmem:[%s2701_s10 + $0x330] sm:$0xff] %v1117_v18  ;;  %v1116_v23 = vmax.f32 %v720_v19, 0.0  ;;  %v1118_v24 = vmax.f32 %v977_v20, 0.0  ;;  %v724_v25 = vadd.f32 %v723_v21, %v2688_v7  ;;  %v981_v26 = vadd.f32 %v980_v22, %v2690_v8 }
 0x1c3   : > { %v725_v27 = vpop.f32.mrf.mxu0  ;;  %v982_v28 = vpop.f32.mrf.mxu1 }
 0x1c4   : > { %1244 = vst [vmem:[%s2701_s10 + $0x328] sm:$0xff] %v1116_v23  ;;  %1246 = vst [vmem:[%s2701_s10 + $0x338] sm:$0xff] %v1118_v24  ;;  %v1119_v29 = vmax.f32 %v724_v25, 0.0  ;;  %v1121_v30 = vmax.f32 %v981_v26, 0.0  ;;  %v726_v31 = vadd.f32 %v725_v27, %v2693_v9  ;;  %v983_v32 = vadd.f32 %v982_v28, %v2695_v10  ;;  %1613 = vmatprep.mubr.f32.mxu0 %v1116_v23 }
 0x1c5   : > { %1870 = vmatprep.mubr.f32.mxu1 %v1118_v24  ;;  %v729_v33 = vpop.f32.mrf.mxu0  ;;  %v986_v34 = vpop.f32.mrf.mxu1  ;;  %1614 = vmatmul.mubr.f32.gmra.mxu0 %v1115_v17 }
 0x1c6   : > { %1871 = vmatmul.mubr.f32.gmra.mxu1 %v1117_v18  ;;  %1247 = vst [vmem:[%s2701_s10 + $0x340] sm:$0xff] %v1119_v29  ;;  %1249 = vst [vmem:[%s2701_s10 + $0x350] sm:$0xff] %v1121_v30  ;;  %v1120_v35 = vmax.f32 %v726_v31, 0.0  ;;  %v1122_v36 = vmax.f32 %v983_v32, 0.0  ;;  %v730_v37 = vadd.f32 %v729_v33, %v2688_v7  ;;  %v987_v38 = vadd.f32 %v986_v34, %v2690_v8 }
 0x1c7   : > { %v731_v39 = vpop.f32.mrf.mxu0  ;;  %v988_v40 = vpop.f32.mrf.mxu1 }
 0x1c8   : > { %1248 = vst [vmem:[%s2701_s10 + $0x348] sm:$0xff] %v1120_v35  ;;  %1250 = vst [vmem:[%s2701_s10 + $0x358] sm:$0xff] %v1122_v36  ;;  %v1123_v41 = vmax.f32 %v730_v37, 0.0  ;;  %v1125_v42 = vmax.f32 %v987_v38, 0.0  ;;  %v732_v43 = vadd.f32 %v731_v39, %v2693_v9  ;;  %v989_v44 = vadd.f32 %v988_v40, %v2695_v10  ;;  %1619 = vmatprep.mubr.f32.mxu0 %v1120_v35 }
 0x1c9   : > { %1876 = vmatprep.mubr.f32.mxu1 %v1122_v36  ;;  %v735_v45 = vpop.f32.mrf.mxu0  ;;  %v992_v46 = vpop.f32.mrf.mxu1  ;;  %1620 = vmatmul.mubr.f32.gmra.mxu0 %v1119_v29 }
 0x1ca   : > { %1877 = vmatmul.mubr.f32.gmra.mxu1 %v1121_v30  ;;  %1251 = vst [vmem:[%s2701_s10 + $0x360] sm:$0xff] %v1123_v41  ;;  %1253 = vst [vmem:[%s2701_s10 + $0x370] sm:$0xff] %v1125_v42  ;;  %v1124_v47 = vmax.f32 %v732_v43, 0.0  ;;  %v1126_v48 = vmax.f32 %v989_v44, 0.0  ;;  %v736_v49 = vadd.f32 %v735_v45, %v2688_v7  ;;  %v993_v50 = vadd.f32 %v992_v46, %v2690_v8 }
 0x1cb   : > { %v737_v51 = vpop.f32.mrf.mxu0  ;;  %v994_v52 = vpop.f32.mrf.mxu1 }
 0x1cc   : > { %1252 = vst [vmem:[%s2701_s10 + $0x368] sm:$0xff] %v1124_v47  ;;  %1254 = vst [vmem:[%s2701_s10 + $0x378] sm:$0xff] %v1126_v48  ;;  %v1127_v53 = vmax.f32 %v736_v49, 0.0  ;;  %v1129_v54 = vmax.f32 %v993_v50, 0.0  ;;  %v738_v55 = vadd.f32 %v737_v51, %v2693_v9  ;;  %v995_v56 = vadd.f32 %v994_v52, %v2695_v10  ;;  %1625 = vmatprep.mubr.f32.mxu0 %v1124_v47 }
 0x1cd   : > { %1882 = vmatprep.mubr.f32.mxu1 %v1126_v48  ;;  %v741_v57 = vpop.f32.mrf.mxu0  ;;  %v998_v58 = vpop.f32.mrf.mxu1  ;;  %1626 = vmatmul.mubr.f32.gmra.mxu0 %v1123_v41 }
 0x1ce   : > { %1883 = vmatmul.mubr.f32.gmra.mxu1 %v1125_v42  ;;  %1255 = vst [vmem:[%s2701_s10 + $0x380] sm:$0xff] %v1127_v53  ;;  %1257 = vst [vmem:[%s2701_s10 + $0x390] sm:$0xff] %v1129_v54  ;;  %v1128_v59 = vmax.f32 %v738_v55, 0.0  ;;  %v1130_v60 = vmax.f32 %v995_v56, 0.0  ;;  %v742_v61 = vadd.f32 %v741_v57, %v2688_v7  ;;  %v999_v62 = vadd.f32 %v998_v58, %v2690_v8 }
 0x1cf   : > { %v743_v63 = vpop.f32.mrf.mxu0  ;;  %v1000_v0 = vpop.f32.mrf.mxu1 }
 0x1d0   : > { %1256 = vst [vmem:[%s2701_s10 + $0x388] sm:$0xff] %v1128_v59  ;;  %1258 = vst [vmem:[%s2701_s10 + $0x398] sm:$0xff] %v1130_v60  ;;  %v1131_v1 = vmax.f32 %v742_v61, 0.0  ;;  %v1133_v2 = vmax.f32 %v999_v62, 0.0  ;;  %v744_v3 = vadd.f32 %v743_v63, %v2693_v9  ;;  %v1001_v4 = vadd.f32 %v1000_v0, %v2695_v10  ;;  %1631 = vmatprep.mubr.f32.mxu0 %v1128_v59 }
 0x1d1   : > { %1888 = vmatprep.mubr.f32.mxu1 %v1130_v60  ;;  %v747_v5 = vpop.f32.mrf.mxu0  ;;  %v1004_v6 = vpop.f32.mrf.mxu1  ;;  %1632 = vmatmul.mubr.f32.gmra.mxu0 %v1127_v53 }
 0x1d2   : > { %1889 = vmatmul.mubr.f32.gmra.mxu1 %v1129_v54  ;;  %1259 = vst [vmem:[%s2701_s10 + $0x3a0] sm:$0xff] %v1131_v1  ;;  %1261 = vst [vmem:[%s2701_s10 + $0x3b0] sm:$0xff] %v1133_v2  ;;  %v1132_v11 = vmax.f32 %v744_v3, 0.0  ;;  %v1134_v12 = vmax.f32 %v1001_v4, 0.0  ;;  %v748_v13 = vadd.f32 %v747_v5, %v2688_v7  ;;  %v1005_v14 = vadd.f32 %v1004_v6, %v2690_v8 }
 0x1d3   : > { %v749_v15 = vpop.f32.mrf.mxu0  ;;  %v1006_v16 = vpop.f32.mrf.mxu1 }
 0x1d4   : > { %1260 = vst [vmem:[%s2701_s10 + $0x3a8] sm:$0xff] %v1132_v11  ;;  %1262 = vst [vmem:[%s2701_s10 + $0x3b8] sm:$0xff] %v1134_v12  ;;  %v1135_v17 = vmax.f32 %v748_v13, 0.0  ;;  %v1137_v18 = vmax.f32 %v1005_v14, 0.0  ;;  %v750_v19 = vadd.f32 %v749_v15, %v2693_v9  ;;  %v1007_v20 = vadd.f32 %v1006_v16, %v2695_v10  ;;  %1637 = vmatprep.mubr.f32.mxu0 %v1132_v11 }
 0x1d5   : > { %1894 = vmatprep.mubr.f32.mxu1 %v1134_v12  ;;  %v753_v21 = vpop.f32.mrf.mxu0  ;;  %v1010_v22 = vpop.f32.mrf.mxu1  ;;  %1638 = vmatmul.mubr.f32.gmra.mxu0 %v1131_v1 }
 0x1d6   : > { %1895 = vmatmul.mubr.f32.gmra.mxu1 %v1133_v2  ;;  %1263 = vst [vmem:[%s2701_s10 + $0x3c0] sm:$0xff] %v1135_v17  ;;  %1265 = vst [vmem:[%s2701_s10 + $0x3d0] sm:$0xff] %v1137_v18  ;;  %v1136_v23 = vmax.f32 %v750_v19, 0.0  ;;  %v1138_v24 = vmax.f32 %v1007_v20, 0.0  ;;  %v754_v25 = vadd.f32 %v753_v21, %v2688_v7  ;;  %v1011_v26 = vadd.f32 %v1010_v22, %v2690_v8 }
 0x1d7   : > { %v755_v27 = vpop.f32.mrf.mxu0  ;;  %v1012_v28 = vpop.f32.mrf.mxu1 }
 0x1d8   : > { %1264 = vst [vmem:[%s2701_s10 + $0x3c8] sm:$0xff] %v1136_v23  ;;  %1266 = vst [vmem:[%s2701_s10 + $0x3d8] sm:$0xff] %v1138_v24  ;;  %v1139_v29 = vmax.f32 %v754_v25, 0.0  ;;  %v1141_v30 = vmax.f32 %v1011_v26, 0.0  ;;  %v756_v31 = vadd.f32 %v755_v27, %v2693_v9  ;;  %v1013_v32 = vadd.f32 %v1012_v28, %v2695_v10  ;;  %1643 = vmatprep.mubr.f32.mxu0 %v1136_v23 }
 0x1d9   : > { %1900 = vmatprep.mubr.f32.mxu1 %v1138_v24  ;;  %1644 = vmatmul.mubr.f32.gmra.mxu0 %v1135_v17 }
 0x1da   : > { %1901 = vmatmul.mubr.f32.gmra.mxu1 %v1137_v18  ;;  %1267 = vst [vmem:[%s2701_s10 + $0x3e0] sm:$0xff] %v1139_v29  ;;  %1269 = vst [vmem:[%s2701_s10 + $0x3f0] sm:$0xff] %v1141_v30  ;;  %v1140_v7 = vmax.f32 %v756_v31, 0.0  ;;  %v1142_v8 = vmax.f32 %v1013_v32, 0.0 }
 0x1dc   : > { %1268 = vst [vmem:[%s2701_s10 + $0x3e8] sm:$0xff] %v1140_v7  ;;  %1270 = vst [vmem:[%s2701_s10 + $0x3f8] sm:$0xff] %v1142_v8  ;;  %1649 = vmatprep.mubr.f32.mxu0 %v1140_v7  ;;  %1906 = vmatprep.mubr.f32.mxu1 %v1142_v8 }
 0x1dd   : > { %1650 = vmatmul.mubr.f32.gmra.mxu0 %v1139_v29 }
 0x1de   : > { %1907 = vmatmul.mubr.f32.gmra.mxu1 %v1141_v30 }
 0x221   : > { %v1465_v9 = vpop.f32.mrf.mxu0 }
 0x222   : > { %v1722_v10 = vpop.f32.mrf.mxu1 }
 0x223   : > { %v1723_v33 = vadd.f32 %v1722_v10, %v1465_v9  ;;  %v1467_v34 = vpop.f32.mrf.mxu0 }
 0x224   : > { %v1724_v35 = vpop.f32.mrf.mxu1 }
 0x225   : > { %1913 = vst [vmem:[%s2966_s11] sm:$0xff] %v1723_v33  ;;  %v1725_v36 = vadd.f32 %v1724_v35, %v1467_v34  ;;  %v1471_v37 = vpop.f32.mrf.mxu0 }
 0x226   : > { %v1728_v38 = vpop.f32.mrf.mxu1 }
 0x227   : > { %2342 = shalt.err (!%p2339_p9)
}
 0x228   : > { %s2343_s13 = scalar_lea.hbm %s2960_s30, 16384  ;;  %s2347_s10 = scalar_lea.hbm %s3109_s4, 32768 }
 0x229   : > { %p2344_p13 = scmp.ne.s32.totalorder %s2960_s30, %s2343_s13  ;;  %p2348_p4 = scmp.lt.s32.totalorder %s2960_s30, %s3109_s4 }
 0x22a   : > { %p2349_p8 = scmp.lt.s32.totalorder %s2347_s10, %s2343_s13 }
 0x22b   : > { %p2345_p5 = pnand %p2344_p13, %p3128_p10 }
 0x22c   : > { %p2350_p7 = por %p2349_p8, %p2348_p4 }
 0x22d   : > { %p2346_p0 = pneg %p2345_p5 }
 0x22f   : > { %p2351_p11 = pnand %p2350_p7, %p2346_p0 }
 0x231   : > { %2354 = shalt.err (!%p2351_p11)
}
 0x232   : > { %s2437_s9 = smov 512   ;;  %s2438_s23 = smov 32   ;;  %1914 = vst [vmem:[%s2966_s11 + $0x8] sm:$0xff] %v1725_v36  ;;  %v1729_v39 = vadd.f32 %v1728_v38, %v1471_v37  ;;  %v1473_v40 = vpop.f32.mrf.mxu0  ;;  %v1730_v41 = vpop.f32.mrf.mxu1 }
 0x233   : > { %2179 = dma.vmem_to_hbm [thread:$0]  (%p3128_p10), %s2962_s16, 16384, %s2960_s30, %s1978_s27, %s2437_s9, %s2437_s9, %s2438_s23   ;;  %v1731_v42 = vadd.f32 %v1730_v41, %v1473_v40 }
 0x234   : > { %1915 = vst [vmem:[%s2966_s11 + $0x10] sm:$0xff] %v1729_v39  ;;  %v1477_v43 = vpop.f32.mrf.mxu0  ;;  %v1734_v44 = vpop.f32.mrf.mxu1  ;;  %s2168_s16 = sshll.u32 %s2493_s22, 13  ;;  %s2014_s30 = sshll.u32 %s2966_s11, 4  ;;  %s3060_s30 = int_to_ptr.vmem [resolvable:$true] %s2014_s30 }
 0x235   : > { %1916 = vst [vmem:[%s2966_s11 + $0x18] sm:$0xff] %v1731_v42  ;;  %v1735_v45 = vadd.f32 %v1734_v44, %v1477_v43  ;;  %s3058_s15 = scalar_lea.hbm %s3110_s5, %s2168_s16  ;;  %s1983_s22 = scalar_lea.sflag [#allocation10], %s2605_s6 }
 0x236   : > { %v1479_v46 = vpop.f32.mrf.mxu0  ;;  %v1736_v47 = vpop.f32.mrf.mxu1  ;;  %s2355_s24 = scalar_lea.vmem %s3060_s30, 8192  ;;  %s2439_s13 = smov [#allocation9]  }
 0x237   : > { %1917 = vst [vmem:[%s2966_s11 + $0x20] sm:$0xff] %v1735_v45  ;;  %v1737_v48 = vadd.f32 %v1736_v47, %v1479_v46  ;;  %p2356_p1 = scmp.ne.s32.totalorder %s3060_s30, %s2355_s24  ;;  %s2359_s26 = sshll.u32 %s2439_s13, 4  ;;  %s2360_s26 = int_to_ptr.vmem [resolvable:$false] %s2359_s26 }
 0x238   : > { %v1483_v49 = vpop.f32.mrf.mxu0  ;;  %v1740_v50 = vpop.f32.mrf.mxu1  ;;  %s2361_s14 = scalar_lea.vmem %s2360_s26, 16384  ;;  %p2362_p12 = scmp.lt.s32.totalorder %s3060_s30, %s2360_s26 }
 0x239   : > { %1918 = vst [vmem:[%s2966_s11 + $0x28] sm:$0xff] %v1737_v48  ;;  %v1741_v51 = vadd.f32 %v1740_v50, %v1483_v49  ;;  %p2357_p2 = pnand %p2356_p1, %p3128_p10  ;;  %p2363_p3 = scmp.lt.s32.totalorder %s2361_s14, %s2355_s24 }
 0x23a   : > { %v1485_v52 = vpop.f32.mrf.mxu0  ;;  %v1742_v53 = vpop.f32.mrf.mxu1 }
 0x23b   : > { %1919 = vst [vmem:[%s2966_s11 + $0x30] sm:$0xff] %v1741_v51  ;;  %v1743_v54 = vadd.f32 %v1742_v53, %v1485_v52  ;;  %p2358_p6 = pneg %p2357_p2  ;;  %p2364_p9 = por %p2363_p3, %p2362_p12 }
 0x23c   : > { %v1489_v55 = vpop.f32.mrf.mxu0  ;;  %v1746_v56 = vpop.f32.mrf.mxu1 }
 0x23d   : > { %1920 = vst [vmem:[%s2966_s11 + $0x38] sm:$0xff] %v1743_v54  ;;  %v1747_v57 = vadd.f32 %v1746_v56, %v1489_v55  ;;  %p2365_p13 = pnand %p2364_p9, %p2358_p6 }
 0x23e   : > { %v1491_v58 = vpop.f32.mrf.mxu0  ;;  %v1748_v59 = vpop.f32.mrf.mxu1 }
 0x23f   : > { %1921 = vst [vmem:[%s2966_s11 + $0x40] sm:$0xff] %v1747_v57  ;;  %v1749_v60 = vadd.f32 %v1748_v59, %v1491_v58 }
 0x240   : > { %v1495_v61 = vpop.f32.mrf.mxu0  ;;  %v1752_v62 = vpop.f32.mrf.mxu1 }
 0x241   : > { %1922 = vst [vmem:[%s2966_s11 + $0x48] sm:$0xff] %v1749_v60  ;;  %v1753_v63 = vadd.f32 %v1752_v62, %v1495_v61 }
 0x242   : > { %v1497_v0 = vpop.f32.mrf.mxu0  ;;  %v1754_v1 = vpop.f32.mrf.mxu1 }
 0x243   : > { %1923 = vst [vmem:[%s2966_s11 + $0x50] sm:$0xff] %v1753_v63  ;;  %v1755_v2 = vadd.f32 %v1754_v1, %v1497_v0 }
 0x244   : > { %v1501_v3 = vpop.f32.mrf.mxu0  ;;  %v1758_v4 = vpop.f32.mrf.mxu1 }
 0x245   : > { %1924 = vst [vmem:[%s2966_s11 + $0x58] sm:$0xff] %v1755_v2  ;;  %v1759_v5 = vadd.f32 %v1758_v4, %v1501_v3 }
 0x246   : > { %v1503_v6 = vpop.f32.mrf.mxu0  ;;  %v1760_v11 = vpop.f32.mrf.mxu1 }
 0x247   : > { %1925 = vst [vmem:[%s2966_s11 + $0x60] sm:$0xff] %v1759_v5  ;;  %v1761_v12 = vadd.f32 %v1760_v11, %v1503_v6 }
 0x248   : > { %v1507_v13 = vpop.f32.mrf.mxu0  ;;  %v1764_v14 = vpop.f32.mrf.mxu1 }
 0x249   : > { %1926 = vst [vmem:[%s2966_s11 + $0x68] sm:$0xff] %v1761_v12  ;;  %v1765_v15 = vadd.f32 %v1764_v14, %v1507_v13 }
 0x24a   : > { %v1509_v16 = vpop.f32.mrf.mxu0  ;;  %v1766_v17 = vpop.f32.mrf.mxu1 }
 0x24b   : > { %1927 = vst [vmem:[%s2966_s11 + $0x70] sm:$0xff] %v1765_v15  ;;  %v1767_v18 = vadd.f32 %v1766_v17, %v1509_v16 }
 0x24c   : > { %v1513_v19 = vpop.f32.mrf.mxu0  ;;  %v1770_v20 = vpop.f32.mrf.mxu1 }
 0x24d   : > { %1928 = vst [vmem:[%s2966_s11 + $0x78] sm:$0xff] %v1767_v18  ;;  %v1771_v21 = vadd.f32 %v1770_v20, %v1513_v19 }
 0x24e   : > { %v1515_v22 = vpop.f32.mrf.mxu0  ;;  %v1772_v23 = vpop.f32.mrf.mxu1 }
 0x24f   : > { %1929 = vst [vmem:[%s2966_s11 + $0x80] sm:$0xff] %v1771_v21  ;;  %v1773_v24 = vadd.f32 %v1772_v23, %v1515_v22 }
 0x250   : > { %v1519_v25 = vpop.f32.mrf.mxu0  ;;  %v1776_v26 = vpop.f32.mrf.mxu1 }
 0x251   : > { %1930 = vst [vmem:[%s2966_s11 + $0x88] sm:$0xff] %v1773_v24  ;;  %v1777_v27 = vadd.f32 %v1776_v26, %v1519_v25 }
 0x252   : > { %v1521_v28 = vpop.f32.mrf.mxu0  ;;  %v1778_v29 = vpop.f32.mrf.mxu1 }
 0x253   : > { %1931 = vst [vmem:[%s2966_s11 + $0x90] sm:$0xff] %v1777_v27  ;;  %v1779_v30 = vadd.f32 %v1778_v29, %v1521_v28 }
 0x254   : > { %v1525_v31 = vpop.f32.mrf.mxu0  ;;  %v1782_v32 = vpop.f32.mrf.mxu1 }
 0x255   : > { %1932 = vst [vmem:[%s2966_s11 + $0x98] sm:$0xff] %v1779_v30  ;;  %v1783_v7 = vadd.f32 %v1782_v32, %v1525_v31 }
 0x256   : > { %v1527_v8 = vpop.f32.mrf.mxu0  ;;  %v1784_v9 = vpop.f32.mrf.mxu1 }
 0x257   : > { %1933 = vst [vmem:[%s2966_s11 + $0xa0] sm:$0xff] %v1783_v7  ;;  %v1785_v10 = vadd.f32 %v1784_v9, %v1527_v8 }
 0x258   : > { %v1531_v33 = vpop.f32.mrf.mxu0  ;;  %v1788_v34 = vpop.f32.mrf.mxu1 }
 0x259   : > { %1934 = vst [vmem:[%s2966_s11 + $0xa8] sm:$0xff] %v1785_v10  ;;  %v1789_v35 = vadd.f32 %v1788_v34, %v1531_v33 }
 0x25a   : > { %v1533_v36 = vpop.f32.mrf.mxu0  ;;  %v1790_v37 = vpop.f32.mrf.mxu1 }
 0x25b   : > { %1935 = vst [vmem:[%s2966_s11 + $0xb0] sm:$0xff] %v1789_v35  ;;  %v1791_v38 = vadd.f32 %v1790_v37, %v1533_v36 }
 0x25c   : > { %v1537_v39 = vpop.f32.mrf.mxu0  ;;  %v1794_v40 = vpop.f32.mrf.mxu1 }
 0x25d   : > { %1936 = vst [vmem:[%s2966_s11 + $0xb8] sm:$0xff] %v1791_v38  ;;  %v1795_v41 = vadd.f32 %v1794_v40, %v1537_v39 }
 0x25e   : > { %v1539_v42 = vpop.f32.mrf.mxu0  ;;  %v1796_v43 = vpop.f32.mrf.mxu1 }
 0x25f   : > { %1937 = vst [vmem:[%s2966_s11 + $0xc0] sm:$0xff] %v1795_v41  ;;  %v1797_v44 = vadd.f32 %v1796_v43, %v1539_v42 }
 0x260   : > { %v1543_v45 = vpop.f32.mrf.mxu0  ;;  %v1800_v46 = vpop.f32.mrf.mxu1 }
 0x261   : > { %1938 = vst [vmem:[%s2966_s11 + $0xc8] sm:$0xff] %v1797_v44  ;;  %v1801_v47 = vadd.f32 %v1800_v46, %v1543_v45 }
 0x262   : > { %v1545_v48 = vpop.f32.mrf.mxu0  ;;  %v1802_v49 = vpop.f32.mrf.mxu1 }
 0x263   : > { %1939 = vst [vmem:[%s2966_s11 + $0xd0] sm:$0xff] %v1801_v47  ;;  %v1803_v50 = vadd.f32 %v1802_v49, %v1545_v48 }
 0x264   : > { %v1549_v51 = vpop.f32.mrf.mxu0  ;;  %v1806_v52 = vpop.f32.mrf.mxu1 }
 0x265   : > { %1940 = vst [vmem:[%s2966_s11 + $0xd8] sm:$0xff] %v1803_v50  ;;  %v1807_v53 = vadd.f32 %v1806_v52, %v1549_v51 }
 0x266   : > { %v1551_v54 = vpop.f32.mrf.mxu0  ;;  %v1808_v55 = vpop.f32.mrf.mxu1 }
 0x267   : > { %1941 = vst [vmem:[%s2966_s11 + $0xe0] sm:$0xff] %v1807_v53  ;;  %v1809_v56 = vadd.f32 %v1808_v55, %v1551_v54 }
 0x268   : > { %v1555_v57 = vpop.f32.mrf.mxu0  ;;  %v1812_v58 = vpop.f32.mrf.mxu1 }
 0x269   : > { %1942 = vst [vmem:[%s2966_s11 + $0xe8] sm:$0xff] %v1809_v56  ;;  %v1813_v59 = vadd.f32 %v1812_v58, %v1555_v57 }
 0x26a   : > { %v1557_v60 = vpop.f32.mrf.mxu0  ;;  %v1814_v61 = vpop.f32.mrf.mxu1 }
 0x26b   : > { %1943 = vst [vmem:[%s2966_s11 + $0xf0] sm:$0xff] %v1813_v59  ;;  %v1815_v62 = vadd.f32 %v1814_v61, %v1557_v60 }
 0x26c   : > { %v1561_v63 = vpop.f32.mrf.mxu0  ;;  %v1818_v0 = vpop.f32.mrf.mxu1 }
 0x26d   : > { %1944 = vst [vmem:[%s2966_s11 + $0xf8] sm:$0xff] %v1815_v62  ;;  %v1819_v1 = vadd.f32 %v1818_v0, %v1561_v63 }
 0x26e   : > { %v1563_v2 = vpop.f32.mrf.mxu0  ;;  %v1820_v3 = vpop.f32.mrf.mxu1 }
 0x26f   : > { %1945 = vst [vmem:[%s2966_s11 + $0x100] sm:$0xff] %v1819_v1  ;;  %v1821_v4 = vadd.f32 %v1820_v3, %v1563_v2 }
 0x270   : > { %v1567_v5 = vpop.f32.mrf.mxu0  ;;  %v1824_v6 = vpop.f32.mrf.mxu1 }
 0x271   : > { %1946 = vst [vmem:[%s2966_s11 + $0x108] sm:$0xff] %v1821_v4  ;;  %v1825_v11 = vadd.f32 %v1824_v6, %v1567_v5 }
 0x272   : > { %v1569_v12 = vpop.f32.mrf.mxu0  ;;  %v1826_v13 = vpop.f32.mrf.mxu1 }
 0x273   : > { %1947 = vst [vmem:[%s2966_s11 + $0x110] sm:$0xff] %v1825_v11  ;;  %v1827_v14 = vadd.f32 %v1826_v13, %v1569_v12 }
 0x274   : > { %v1573_v15 = vpop.f32.mrf.mxu0  ;;  %v1830_v16 = vpop.f32.mrf.mxu1 }
 0x275   : > { %1948 = vst [vmem:[%s2966_s11 + $0x118] sm:$0xff] %v1827_v14  ;;  %v1831_v17 = vadd.f32 %v1830_v16, %v1573_v15 }
 0x276   : > { %v1575_v18 = vpop.f32.mrf.mxu0  ;;  %v1832_v19 = vpop.f32.mrf.mxu1 }
 0x277   : > { %1949 = vst [vmem:[%s2966_s11 + $0x120] sm:$0xff] %v1831_v17  ;;  %v1833_v20 = vadd.f32 %v1832_v19, %v1575_v18 }
 0x278   : > { %v1579_v21 = vpop.f32.mrf.mxu0  ;;  %v1836_v22 = vpop.f32.mrf.mxu1 }
 0x279   : > { %1950 = vst [vmem:[%s2966_s11 + $0x128] sm:$0xff] %v1833_v20  ;;  %v1837_v23 = vadd.f32 %v1836_v22, %v1579_v21 }
 0x27a   : > { %v1581_v24 = vpop.f32.mrf.mxu0  ;;  %v1838_v25 = vpop.f32.mrf.mxu1 }
 0x27b   : > { %1951 = vst [vmem:[%s2966_s11 + $0x130] sm:$0xff] %v1837_v23  ;;  %v1839_v26 = vadd.f32 %v1838_v25, %v1581_v24 }
 0x27c   : > { %v1585_v27 = vpop.f32.mrf.mxu0  ;;  %v1842_v28 = vpop.f32.mrf.mxu1 }
 0x27d   : > { %1952 = vst [vmem:[%s2966_s11 + $0x138] sm:$0xff] %v1839_v26  ;;  %v1843_v29 = vadd.f32 %v1842_v28, %v1585_v27 }
 0x27e   : > { %v1587_v30 = vpop.f32.mrf.mxu0  ;;  %v1844_v31 = vpop.f32.mrf.mxu1 }
 0x27f   : > { %1953 = vst [vmem:[%s2966_s11 + $0x140] sm:$0xff] %v1843_v29  ;;  %v1845_v32 = vadd.f32 %v1844_v31, %v1587_v30 }
 0x280   : > { %v1591_v7 = vpop.f32.mrf.mxu0  ;;  %v1848_v8 = vpop.f32.mrf.mxu1 }
 0x281   : > { %1954 = vst [vmem:[%s2966_s11 + $0x148] sm:$0xff] %v1845_v32  ;;  %v1849_v9 = vadd.f32 %v1848_v8, %v1591_v7 }
 0x282   : > { %v1593_v10 = vpop.f32.mrf.mxu0  ;;  %v1850_v33 = vpop.f32.mrf.mxu1 }
 0x283   : > { %1955 = vst [vmem:[%s2966_s11 + $0x150] sm:$0xff] %v1849_v9  ;;  %v1851_v34 = vadd.f32 %v1850_v33, %v1593_v10 }
 0x284   : > { %v1597_v35 = vpop.f32.mrf.mxu0  ;;  %v1854_v36 = vpop.f32.mrf.mxu1 }
 0x285   : > { %1956 = vst [vmem:[%s2966_s11 + $0x158] sm:$0xff] %v1851_v34  ;;  %v1855_v37 = vadd.f32 %v1854_v36, %v1597_v35 }
 0x286   : > { %v1599_v38 = vpop.f32.mrf.mxu0  ;;  %v1856_v39 = vpop.f32.mrf.mxu1 }
 0x287   : > { %1957 = vst [vmem:[%s2966_s11 + $0x160] sm:$0xff] %v1855_v37  ;;  %v1857_v40 = vadd.f32 %v1856_v39, %v1599_v38 }
 0x288   : > { %v1603_v41 = vpop.f32.mrf.mxu0  ;;  %v1860_v42 = vpop.f32.mrf.mxu1 }
 0x289   : > { %1958 = vst [vmem:[%s2966_s11 + $0x168] sm:$0xff] %v1857_v40  ;;  %v1861_v43 = vadd.f32 %v1860_v42, %v1603_v41 }
 0x28a   : > { %v1605_v44 = vpop.f32.mrf.mxu0  ;;  %v1862_v45 = vpop.f32.mrf.mxu1 }
 0x28b   : > { %1959 = vst [vmem:[%s2966_s11 + $0x170] sm:$0xff] %v1861_v43  ;;  %v1863_v46 = vadd.f32 %v1862_v45, %v1605_v44 }
 0x28c   : > { %v1609_v47 = vpop.f32.mrf.mxu0  ;;  %v1866_v48 = vpop.f32.mrf.mxu1 }
 0x28d   : > { %1960 = vst [vmem:[%s2966_s11 + $0x178] sm:$0xff] %v1863_v46  ;;  %v1867_v49 = vadd.f32 %v1866_v48, %v1609_v47 }
 0x28e   : > { %v1611_v50 = vpop.f32.mrf.mxu0  ;;  %v1868_v51 = vpop.f32.mrf.mxu1 }
 0x28f   : > { %1961 = vst [vmem:[%s2966_s11 + $0x180] sm:$0xff] %v1867_v49  ;;  %v1869_v52 = vadd.f32 %v1868_v51, %v1611_v50 }
 0x290   : > { %v1615_v53 = vpop.f32.mrf.mxu0  ;;  %v1872_v54 = vpop.f32.mrf.mxu1 }
 0x291   : > { %1962 = vst [vmem:[%s2966_s11 + $0x188] sm:$0xff] %v1869_v52  ;;  %v1873_v55 = vadd.f32 %v1872_v54, %v1615_v53 }
 0x292   : > { %v1617_v56 = vpop.f32.mrf.mxu0  ;;  %v1874_v57 = vpop.f32.mrf.mxu1 }
 0x293   : > { %1963 = vst [vmem:[%s2966_s11 + $0x190] sm:$0xff] %v1873_v55  ;;  %v1875_v58 = vadd.f32 %v1874_v57, %v1617_v56 }
 0x294   : > { %v1621_v59 = vpop.f32.mrf.mxu0  ;;  %v1878_v60 = vpop.f32.mrf.mxu1 }
 0x295   : > { %1964 = vst [vmem:[%s2966_s11 + $0x198] sm:$0xff] %v1875_v58  ;;  %v1879_v61 = vadd.f32 %v1878_v60, %v1621_v59 }
 0x296   : > { %v1623_v62 = vpop.f32.mrf.mxu0  ;;  %v1880_v63 = vpop.f32.mrf.mxu1 }
 0x297   : > { %1965 = vst [vmem:[%s2966_s11 + $0x1a0] sm:$0xff] %v1879_v61  ;;  %v1881_v0 = vadd.f32 %v1880_v63, %v1623_v62 }
 0x298   : > { %v1627_v1 = vpop.f32.mrf.mxu0  ;;  %v1884_v2 = vpop.f32.mrf.mxu1 }
 0x299   : > { %1966 = vst [vmem:[%s2966_s11 + $0x1a8] sm:$0xff] %v1881_v0  ;;  %v1885_v3 = vadd.f32 %v1884_v2, %v1627_v1 }
 0x29a   : > { %v1629_v4 = vpop.f32.mrf.mxu0  ;;  %v1886_v5 = vpop.f32.mrf.mxu1 }
 0x29b   : > { %1967 = vst [vmem:[%s2966_s11 + $0x1b0] sm:$0xff] %v1885_v3  ;;  %v1887_v6 = vadd.f32 %v1886_v5, %v1629_v4 }
 0x29c   : > { %v1633_v11 = vpop.f32.mrf.mxu0  ;;  %v1890_v12 = vpop.f32.mrf.mxu1 }
 0x29d   : > { %1968 = vst [vmem:[%s2966_s11 + $0x1b8] sm:$0xff] %v1887_v6  ;;  %v1891_v13 = vadd.f32 %v1890_v12, %v1633_v11 }
 0x29e   : > { %v1635_v14 = vpop.f32.mrf.mxu0  ;;  %v1892_v15 = vpop.f32.mrf.mxu1 }
 0x29f   : > { %1969 = vst [vmem:[%s2966_s11 + $0x1c0] sm:$0xff] %v1891_v13  ;;  %v1893_v16 = vadd.f32 %v1892_v15, %v1635_v14 }
 0x2a0   : > { %v1639_v17 = vpop.f32.mrf.mxu0  ;;  %v1896_v18 = vpop.f32.mrf.mxu1 }
 0x2a1   : > { %1970 = vst [vmem:[%s2966_s11 + $0x1c8] sm:$0xff] %v1893_v16  ;;  %v1897_v19 = vadd.f32 %v1896_v18, %v1639_v17 }
 0x2a2   : > { %v1641_v20 = vpop.f32.mrf.mxu0  ;;  %v1898_v21 = vpop.f32.mrf.mxu1 }
 0x2a3   : > { %1971 = vst [vmem:[%s2966_s11 + $0x1d0] sm:$0xff] %v1897_v19  ;;  %v1899_v22 = vadd.f32 %v1898_v21, %v1641_v20 }
 0x2a4   : > { %v1645_v23 = vpop.f32.mrf.mxu0  ;;  %v1902_v24 = vpop.f32.mrf.mxu1 }
 0x2a5   : > { %1972 = vst [vmem:[%s2966_s11 + $0x1d8] sm:$0xff] %v1899_v22  ;;  %v1903_v25 = vadd.f32 %v1902_v24, %v1645_v23 }
 0x2a6   : > { %v1647_v26 = vpop.f32.mrf.mxu0  ;;  %v1904_v27 = vpop.f32.mrf.mxu1 }
 0x2a7   : > { %1973 = vst [vmem:[%s2966_s11 + $0x1e0] sm:$0xff] %v1903_v25  ;;  %v1905_v28 = vadd.f32 %v1904_v27, %v1647_v26 }
 0x2a8   : > { %v1651_v29 = vpop.f32.mrf.mxu0  ;;  %v1908_v30 = vpop.f32.mrf.mxu1 }
 0x2a9   : > { %1974 = vst [vmem:[%s2966_s11 + $0x1e8] sm:$0xff] %v1905_v28  ;;  %v1909_v31 = vadd.f32 %v1908_v30, %v1651_v29 }
 0x2aa   : > { %v1653_v32 = vpop.f32.mrf.mxu0  ;;  %v1910_v7 = vpop.f32.mrf.mxu1 }
 0x2ab   : > { %1975 = vst [vmem:[%s2966_s11 + $0x1f0] sm:$0xff] %v1909_v31  ;;  %v1911_v8 = vadd.f32 %v1910_v7, %v1653_v32 }
 0x2ad   : > { %1976 = vst [vmem:[%s2966_s11 + $0x1f8] sm:$0xff] %v1911_v8 }
 0x2ae   : > { %2368 = shalt.err (!%p2365_p13)
}
 0x2af   : > { %s2369_s11 = scalar_lea.hbm %s3058_s15, 8192  ;;  %s2373_s8 = scalar_lea.hbm %s3110_s5, 16384 }
 0x2b0   : > { %p2370_p5 = scmp.ne.s32.totalorder %s3058_s15, %s2369_s11  ;;  %p2374_p8 = scmp.lt.s32.totalorder %s3058_s15, %s3110_s5 }
 0x2b1   : > { %p2375_p7 = scmp.lt.s32.totalorder %s2373_s8, %s2369_s11 }
 0x2b2   : > { %p2371_p0 = pnand %p2370_p5, %p3128_p10 }
 0x2b3   : > { %p2376_p11 = por %p2375_p7, %p2374_p8 }
 0x2b4   : > { %p2372_p4 = pneg %p2371_p0 }
 0x2b6   : > { %p2377_p1 = pnand %p2376_p11, %p2372_p4 }
 0x2b8   : > { %2380 = shalt.err (!%p2377_p1)
}
 0x2b9   : > { %s2440_s16 = smov 256   ;;  %s2441_s27 = smov 16  }
 0x2ba   : > { %2180 = dma.vmem_to_hbm [thread:$0]  (%p3128_p10), %s3060_s30, 8192, %s3058_s15, %s1983_s22, %s2440_s16, %s2440_s16, %s2441_s27  }
 0x2bb PF: > { %s2029_s7 = sand.u32 1, %s2415_s18   ;;  %p3129_p2 = scmp.ne.s32.totalorder %s3117_s25, 0 }
 0x2bc   : > { %p3130_p6 = scmp.ge.s32.totalorder %s2427_s21, 2  ;;  %s2030_s24 = scalar_lea.sflag [#allocation4], %s2029_s7 }
 0x2be   : > { %p2195_p12 = pnand %p3130_p6, %p3129_p2 }
 0x2c0   : > { %p2196_p3 = pneg %p2195_p12 }
 0x2c2   : > { %2406 = dma.done.wait (%p2196_p3), %s2030_s24, 16384  }
 0x2c3   : > { %2408 = vsyncadd (%p2196_p3), %s2030_s24, 4294950912  ;;  %s2039_s13 = scalar_lea.sflag [#allocation10], %s2029_s7 }
 0x2c4   : > { %2410 = dma.done.wait (%p2196_p3), %s2039_s13, 8192  }
 0x2c5   : > { %2412 = vsyncadd (%p2196_p3), %s2039_s13, 4294959104  ;;  %p23_p10 = scmp.ge.s32.totalorder %s2547_s17, 4   ;;  %s3131_s18 = smov %s2419_s19 }
 0x2c6   : > { %s3132_s19 = smov %s2423_s20  ;;  %s3133_s20 = smov %s2556_s28 }
 0x2c7   : > { %s3134_s21 = smov %s2547_s17  ;;  %25 = sbr.rel (!%p23_p10) target bundleno = 8 (0x8), region = 106 }
 0x2cc   :  { %2044 = vsyncpa [#allocation3], 1 }
 0x2cd   :  { %2046 = vsyncpa [#allocation3 + $0x1], 1 }
 0x2ce   :  { %2047 = vsyncpa [#allocation6], 1 }
 0x2cf   :  { %2048 = vsyncpa [#allocation4], 1 }
 0x2d0   :  { %2050 = vsyncpa [#allocation4 + $0x1], 1 }
 0x2d1   :  { %2051 = vsyncpa [#allocation10], 1 }
 0x2d2   :  { %2053 = vsyncpa [#allocation10 + $0x1], 1 }

</bundles_post_ra>
